<compile_context>
chip_gen: v6e
topology: v6e:2x2x1
jax: 0.10.0
libtpu: 0.0.40
codegen_flags: <defaults>
</compile_context>

<pallas_src>
import math

import jax
import jax.numpy as jnp
from jax import lax
from jax.experimental import pallas as pl
from jax.experimental.pallas import tpu as pltpu

_MIB = 1024 * 1024


def _round_up(x, m):
    return ((x + m - 1) // m) * m


def _vmem_capacity_bytes():
    try:
        return int(pltpu.get_tpu_info().vmem_capacity_bytes)
    except Exception:
        return 64 * _MIB  # conservative (v7x per-TC size)


def _token_tile_budget():
    # Generation-aware: v7x-class parts (~64 MiB VMEM/TC, ~3.2 TB/s HBM) want bigger
    # tiles to amortize the ~0.35 us per-step overhead; 128 MiB parts (v5e/v6e) sit at
    # the ~90% HBM-roofline point around 4 MiB.
    return 6 * _MIB if _vmem_capacity_bytes() <= 96 * _MIB else 4 * _MIB


def _choose_tile_rows(n_rows, n_cols, elem_bytes, bytes_budget, row_align):
    full = _round_up(max(n_rows, 1), row_align)
    cap = max(row_align,
              (bytes_budget // max(n_cols * elem_bytes, 1)) // row_align * row_align)
    return min(full, cap)


def _choose_cap_tile(n_rows, n_cols, elem_bytes, bytes_budget):
    # Single resident-ish tile if it fits the budget; otherwise a 128-multiple row tile
    # so the matching cpool lane dim stays (8,128)-legal.
    full = _round_up(max(n_rows, 1), 16)
    if full * n_cols * elem_bytes <= bytes_budget:
        return full
    return max(128, (bytes_budget // max(n_cols * elem_bytes, 1)) // 128 * 128)


def _block_diag_mean_pool(lengths_m1, seq_len):
    """(B,1) int lengths -> (B, B*seq_len) f32 block-diagonal masked-mean weights."""
    b = lengths_m1.shape[0]
    lengths_m1 = lengths_m1.reshape(b, 1).astype(jnp.int32)
    pos = jnp.arange(seq_len, dtype=jnp.int32)[None, :]            # (1, L)
    mask = (pos < lengths_m1).astype(jnp.float32)                  # (B, L)
    denom = jnp.maximum(lengths_m1, 1).astype(jnp.float32)         # clamp: lens-1 can be 0
    w = mask / denom                                               # (B, L)
    eye = jnp.eye(b, dtype=jnp.float32)                            # (B, B)
    return (eye[:, :, None] * w[None, :, :]).reshape(b, b * seq_len)


def _make_fused_kernel(n_tokens, n_cap_tiles, n_kl_elems, bsz, sample_method,
                       pos_weight=1.0, eps=1e-7):
    log_eps = math.log(eps)
    log_1m_eps = math.log(1.0 - eps)

    def kernel(logits_ref, tgt_ref, cap_ref, cpool_ref,
               qm_ref, ql_ref, pm_ref, plg_ref,
               label_ref, aproj_ref, emb_ref, wout_ref,
               out_ref, ce_acc, cap_acc):
        c = pl.program_id(0)          # token-stream split (2 TCs on v7x via "parallel")
        i = pl.program_id(1)
        n_steps = pl.num_programs(1)

        @pl.when(i == 0)
        def _init():
            ce_acc[...] = jnp.zeros_like(ce_acc)
            cap_acc[...] = jnp.zeros_like(cap_acc)

        # ---- criterion stand-in: softmax cross-entropy partial sum (this slice's tiles) ----
        x = logits_ref[...].astype(jnp.float32)              # streamed bf16, math in f32
        tn, v = x.shape
        m = jnp.max(x, axis=-1, keepdims=True)
        # TODO(synk): on v7x do the exp in bf16 (frees the EUP slot) and keep the row-sum f32.
        lse = m + jnp.log(jnp.sum(jnp.exp(x - m), axis=-1, keepdims=True))
        col = lax.broadcasted_iota(jnp.int32, (tn, v), 1)
        picked = jnp.sum(jnp.where(col == tgt_ref[...], x, 0.0), axis=-1, keepdims=True)
        tile_idx = c * n_steps + i                            # global token-tile index
        rows = tile_idx * tn + lax.broadcasted_iota(jnp.int32, (tn, 1), 0)
        valid = (rows < n_tokens).astype(jnp.float32)         # masks padded/clamped tiles
        ce_acc[...] += jnp.sum((lse - picked) * valid, axis=0, keepdims=True)

        # ---- caption sample + embedding pool, streamed tile-by-tile on slice 0 ----
        # Argmax/softmax VALU work and the cap_logits DMA now overlap the CE stream;
        # one-hot preds never touch HBM; padded caption rows have zero cpool weight.
        @pl.when(jnp.logical_and(c == 0, i < n_cap_tiles))
        def _caption():
            lg = cap_ref[...].astype(jnp.float32)             # (cap_tile, V)
            nv = lg.shape[1]
            mx = jnp.max(lg, axis=-1, keepdims=True)
            if sample_method == "argmax":
                colv = lax.broadcasted_iota(jnp.int32, lg.shape, 1)
                # Exact first-index tie-break (matches torch.max CPU semantics); the extra
                # compare/select pass is hidden behind the CE DMA stream.
                first = jnp.min(jnp.where(lg == mx, colv, nv), axis=-1, keepdims=True)
                preds = (colv == first).astype(jnp.bfloat16)  # exact 0/1 in bf16
            else:  # "weighted": exact softmax divide (no approx reciprocal) for parity
                e = jnp.exp(lg - mx)
                preds = (e / jnp.sum(e, axis=-1, keepdims=True)).astype(jnp.bfloat16)
            # bf16 operands, f32 accumulation on the MXU.
            cap_emb = jnp.dot(preds, emb_ref[...], preferred_element_type=jnp.float32)
            cap_acc[...] += jnp.dot(cpool_ref[...], cap_emb,
                                    preferred_element_type=jnp.float32)   # (B,H)

        # ---- tiny epilogue on the last step of each slice ----
        @pl.when(i == n_steps - 1)
        def _finalize():
            # kl_loss stand-in: KL(N(qm,e^ql) || N(pm,e^pg)), mean over elements.
            qm = qm_ref[...].astype(jnp.float32)
            ql = ql_ref[...].astype(jnp.float32)
            pm = pm_ref[...].astype(jnp.float32)
            pg = plg_ref[...].astype(jnp.float32)
            kl = (pg - ql) + (jnp.exp(2.0 * ql) + (qm - pm) ** 2) / (2.0 * jnp.exp(2.0 * pg)) - 0.5
            kl_sum = jnp.sum(jnp.sum(kl, axis=1, keepdims=True), axis=0, keepdims=True)
            kl_mean = kl_sum * (1.0 / n_kl_elems)                          # (1,1)

            # Discriminator tail ((B,H) only).  wout as a (1,H) row -> VPU mul+reduce
            # instead of an N=1 MXU matmul.
            hid = jnp.tanh(cap_acc[...] + aproj_ref[...])                  # (B,H)
            logit = jnp.sum(hid * wout_ref[...], axis=-1, keepdims=True)   # (B,1)

            # Bce_logits_Loss on sigmoid(logit) with clamp to [eps, 1-eps], in log-space
            # (log-sigmoid) so it is stable at saturation; identical value since log is
            # monotone and the clamp commutes.
            z = logit
            soft_abs = jnp.log(1.0 + jnp.exp(-jnp.abs(z)))
            log_p = jnp.clip(-(jnp.maximum(-z, 0.0) + soft_abs), log_eps, log_1m_eps)
            log_1mp = jnp.clip(-(jnp.maximum(z, 0.0) + soft_abs), log_eps, log_1m_eps)
            t = label_ref[...].astype(jnp.float32)
            bce = -(pos_weight * t * log_p + (1.0 - t) * log_1mp)
            bce_mean = jnp.sum(bce, axis=0, keepdims=True) * (1.0 / bsz)   # (1,1)

            # Lane-dense (8,128) row per slice: lane0 = unnormalized CE partial sum,
            # lane1 = kl, lane2 = bce.  Only slice 0's kl/bce are consumed by the wrapper.
            lane = lax.broadcasted_iota(jnp.int32, (8, 128), 1)
            row = lax.broadcasted_iota(jnp.int32, (8, 128), 0)
            on0 = row == 0
            vals = jnp.where(jnp.logical_and(on0, lane == 0), ce_acc[...], 0.0)
            vals = jnp.where(jnp.logical_and(on0, lane == 1), kl_mean, vals)
            vals = jnp.where(jnp.logical_and(on0, lane == 2), bce_mean, vals)
            out_ref[...] = vals.astype(out_ref.dtype)

    return kernel


class AdverseLossWrapperPallas:
    """JAX/Pallas equivalent of AdverseLossWrapper.forward (single fused kernel)."""

    def __init__(self, dscrm_params, alpha=1.0, beta=1.0, sample_method="argmax"):
        if sample_method not in ("argmax", "weighted"):
            # TODO(synk): 'gumbel' sampling needs in-kernel RNG (pltpu.prng_*); not wired here.
            raise NotImplementedError(f"sample method {sample_method} not supported")
        self.alpha = alpha
        self.beta = beta
        self.sample_method = sample_method
        self.dscrm_params = dscrm_params  # dict: emb (V,H), wa (Da,H), b (1,H), wout (H,1)

    def __call__(self, output):
        f32 = jnp.float32
        # ---- wrapper-side (free XLA) layout plumbing: reshapes, masks, padding ----
        packed_logits = output["packed_logits"]
        n_tokens, v = packed_logits.shape
        packed_bf16 = packed_logits.astype(jnp.bfloat16)        # halve CE stream bytes
        targets = output["targets"].reshape(-1, 1).astype(jnp.int32)

        dz = output["q_means"].shape[-1]
        qm = output["q_means"].reshape(-1, dz).astype(f32)
        ql = output["q_logs"].reshape(-1, dz).astype(f32)
        pm = output["p_means"].reshape(-1, dz).astype(f32)
        pg = output["p_logs"].reshape(-1, dz).astype(f32)
        n_kl_elems = qm.shape[0] * qm.shape[1]

        logits = output["logits"]
        b, l, vc = logits.shape
        cap_bf16 = logits.reshape(b * l, vc).astype(jnp.bfloat16)
        label = output["label"].astype(f32).reshape(b, 1)

        # Audio branch depends on nothing computed in-kernel -> fold it in XLA.
        p = self.dscrm_params
        lens_m1 = output["lens"].reshape(b, 1).astype(jnp.int32) - 1
        feats_lens = output["feats_lens"].reshape(b, 1).astype(jnp.int32)
        audio = output["audio_feats"].astype(f32)
        t_frames = audio.shape[1]
        fmask = (jnp.arange(t_frames, dtype=jnp.int32)[None, :] < feats_lens).astype(f32)
        a_pool = jnp.einsum("bt,btd->bd", fmask, audio) / jnp.maximum(feats_lens, 1).astype(f32)
        a_proj = a_pool @ p["wa"].astype(f32) + p["b"].astype(f32)   # (B,H) incl. bias

        emb = p["emb"].astype(jnp.bfloat16)                      # bf16 MXU feed
        h = emb.shape[1]
        wout_row = p["wout"].astype(f32).reshape(1, h)           # (1,H): VPU mul+reduce

        # Caption tiling + block-diagonal masked-mean pooling matrix (zero-padded cols).
        cap_tile = _choose_cap_tile(b * l, vc, 2, 2 * _MIB)
        cap_pad = _round_up(b * l, cap_tile)
        n_cap_tiles = cap_pad // cap_tile
        cpool = _block_diag_mean_pool(lens_m1, l)                # (B, B*L)
        if cap_pad != b * l:
            cap_bf16 = jnp.pad(cap_bf16, ((0, cap_pad - b * l), (0, 0)))
            cpool = jnp.pad(cpool, ((0, 0), (0, cap_pad - b * l)))

        # Token tiling (generation-aware budget), 2-way split over the leading grid axis.
        tile_n = _choose_tile_rows(n_tokens, v, 2, _token_tile_budget(), 16)
        n_ce_tiles = pl.cdiv(max(n_tokens, 1), tile_n)
        n_pad = n_ce_tiles * tile_n
        if n_pad != n_tokens:
            packed_bf16 = jnp.pad(packed_bf16, ((0, n_pad - n_tokens), (0, 0)))
            targets = jnp.pad(targets, ((0, n_pad - n_tokens), (0, 0)))

        num_splits = 2                                           # 2 TCs on v7x; harmless on 1-TC chips
        n_steps = max(pl.cdiv(n_ce_tiles, num_splits), n_cap_tiles)
        ce_last = n_ce_tiles - 1
        cap_last = n_cap_tiles - 1

        def tok_map(c, i):
            return (jnp.minimum(c * n_steps + i, ce_last), 0)

        def cap_map(c, i):   # slice 1 pins to the last tile -> fetched once, never used
            return (jnp.minimum(i + c * n_cap_tiles, cap_last), 0)

        def cpool_map(c, i):
            return (0, jnp.minimum(i + c * n_cap_tiles, cap_last))

        kernel = _make_fused_kernel(n_tokens, n_cap_tiles, n_kl_elems, b,
                                    self.sample_method)

        # Explicit scoped-VMEM limit: 2x streamed tiles + residents + slack, clamped to
        # the generation's physical ceiling.
        stream_bytes = 2 * (tile_n * v * 2 + tile_n * 4 +
                            cap_tile * vc * 2 + max(b, 8) * cap_tile * 4)
        resident_bytes = 2 * (4 * qm.size * 4 + emb.size * 2 + label.size * 4 +
                              a_proj.size * 4 + wout_row.size * 4)
        need = stream_bytes + resident_bytes + 2 * _MIB
        vmem_cap = max(32 * _MIB, _vmem_capacity_bytes() - 16 * _MIB)
        vmem_limit = int(min(max(need, 32 * _MIB), vmem_cap))

        def resident(shape, single_buffer):
            if single_buffer:
                return pl.BlockSpec(shape, lambda c, i: (0, 0),
                                    pipeline_mode=pl.Buffered(1))
            return pl.BlockSpec(shape, lambda c, i: (0, 0))

        def run(single_buffer):
            in_specs = [
                pl.BlockSpec((tile_n, v), tok_map),       # packed_logits (tiled, bf16)
                pl.BlockSpec((tile_n, 1), tok_map),       # targets       (tiled)
                pl.BlockSpec((cap_tile, vc), cap_map),    # caption logits (tiled, bf16)
                pl.BlockSpec((b, cap_tile), cpool_map),   # caption pooling cols (tiled)
                resident(qm.shape, single_buffer),
                resident(ql.shape, single_buffer),
                resident(pm.shape, single_buffer),
                resident(pg.shape, single_buffer),
                resident(label.shape, single_buffer),
                resident(a_proj.shape, single_buffer),
                resident(emb.shape, single_buffer),
                resident(wout_row.shape, single_buffer),
            ]
            return pl.pallas_call(
                kernel,
                out_shape=jax.ShapeDtypeStruct((num_splits * 8, 128), jnp.float32),
                grid=(num_splits, n_steps),
                in_specs=in_specs,
                out_specs=pl.BlockSpec((8, 128), lambda c, i: (c, 0)),
                scratch_shapes=[pltpu.VMEM((1, 1), jnp.float32),   # CE partial sum
                                pltpu.VMEM((b, h), jnp.float32)],  # pooled caption emb
                compiler_params=pltpu.CompilerParams(
                    dimension_semantics=("parallel", "arbitrary"),
                    vmem_limit_bytes=vmem_limit),
            )(packed_bf16, targets, cap_bf16, cpool,
              qm, ql, pm, pg, label, a_proj, emb, wout_row)

        try:
            out = run(True)       # single-buffered residents (halves their VMEM cost)
        except Exception:
            out = run(False)      # this jax build rejects pl.Buffered(1): use defaults

        # Combine per-slice CE partials and the loss scalars (cheap XLA scalar math).
        loss_criterion = jnp.sum(out[0::8, 0]) / n_tokens
        loss_kl = out[0, 1]
        loss_dscrm = out[0, 2]
        # Mirrors the PyTorch module: the combined value is overwritten (when alpha>0
        # only loss_dscrm is returned as `loss`; alpha is never used as a scale there).
        if self.alpha > 0:
            loss = loss_dscrm
        else:
            loss = loss_criterion + self.beta * loss_kl
        return loss, loss_criterion, loss_kl, loss_dscrm


if __name__ == "__main__":
    key = jax.random.PRNGKey(0)
    ks = jax.random.split(key, 12)

    B, L, V = 2, 8, 32        # batch, caption length, vocab (n_class)
    Dz = 16                   # latent dim for KL
    T, Da = 16, 32            # audio frames, audio feature dim
    H = 32                    # discriminator hidden dim
    N = 12                    # packed token count

    output = {
        "packed_logits": jax.random.normal(ks[0], (N, V), jnp.float32),
        "targets": jax.random.randint(ks[1], (N,), 0, V, jnp.int32),
        "q_means": jax.random.normal(ks[2], (B, L, Dz), jnp.float32),
        "q_logs": 0.1 * jax.random.normal(ks[3], (B, L, Dz), jnp.float32),
        "p_means": jax.random.normal(ks[4], (B, L, Dz), jnp.float32),
        "p_logs": 0.1 * jax.random.normal(ks[5], (B, L, Dz), jnp.float32),
        "logits": jax.random.normal(ks[6], (B, L, V), jnp.float32),
        "label": jnp.array([[1.0], [0.0]], jnp.float32),
        "lens": jnp.array([[6], [8]], jnp.int32),
        "audio_feats": jax.random.normal(ks[7], (B, T, Da), jnp.float32),
        "feats_lens": jnp.array([[12], [16]], jnp.int32),
    }

    dscrm_params = {
        "emb": 0.1 * jax.random.normal(ks[8], (V, H), jnp.float32),
        "wa": 0.1 * jax.random.normal(ks[9], (Da, H), jnp.float32),
        "b": 0.1 * jax.random.normal(ks[10], (1, H), jnp.float32),
        "wout": 0.1 * jax.random.normal(ks[11], (H, 1), jnp.float32),
    }

    wrapper = AdverseLossWrapperPallas(dscrm_params, alpha=1.0, beta=1.0,
                                       sample_method="argmax")
    loss, loss_criterion, loss_kl, loss_dscrm = wrapper(output)
    jax.block_until_ready((loss, loss_criterion, loss_kl, loss_dscrm))
    print("KERNEL_OK")
</pallas_src>

<mosaic_0001>
module attributes {stable_mosaic.version = 11 : i64} {
  func.func @kernel(%arg0: i32, %arg1: i32, %arg2: memref<16x32xbf16, #tpu.memory_space<vmem>>, %arg3: memref<16x1xi32, #tpu.memory_space<vmem>>, %arg4: memref<16x32xbf16, #tpu.memory_space<vmem>>, %arg5: memref<2x16xf32, #tpu.memory_space<vmem>>, %arg6: memref<16x16xf32, #tpu.memory_space<vmem>>, %arg7: memref<16x16xf32, #tpu.memory_space<vmem>>, %arg8: memref<16x16xf32, #tpu.memory_space<vmem>>, %arg9: memref<16x16xf32, #tpu.memory_space<vmem>>, %arg10: memref<2x1xf32, #tpu.memory_space<vmem>>, %arg11: memref<2x32xf32, #tpu.memory_space<vmem>>, %arg12: memref<32x32xbf16, #tpu.memory_space<vmem>>, %arg13: memref<1x32xf32, #tpu.memory_space<vmem>>, %arg14: memref<8x128xf32, #tpu.memory_space<vmem>>, %arg15: memref<1x1xf32, #tpu.memory_space<vmem>>, %arg16: memref<2x32xf32, #tpu.memory_space<vmem>>) attributes {dimension_semantics = [#tpu.dimension_semantics<parallel>, #tpu.dimension_semantics<arbitrary>], iteration_bounds = array<i64: 2, 1>, scalar_prefetch = 0 : i64, scratch_operands = 2 : i64, tpu.core_type = #tpu.core_type<tc>, window_params = [{transform_indices = @transform_0, window_bounds = array<i64: 16, 32>}, {transform_indices = @transform_1, window_bounds = array<i64: 16, 1>}, {transform_indices = @transform_2, window_bounds = array<i64: 16, 32>}, {transform_indices = @transform_3, window_bounds = array<i64: 2, 16>}, {pipeline_mode = #tpu.pipeline_mode<synchronous>, transform_indices = @transform_4, window_bounds = array<i64: 16, 16>}, {pipeline_mode = #tpu.pipeline_mode<synchronous>, transform_indices = @transform_5, window_bounds = array<i64: 16, 16>}, {pipeline_mode = #tpu.pipeline_mode<synchronous>, transform_indices = @transform_6, window_bounds = array<i64: 16, 16>}, {pipeline_mode = #tpu.pipeline_mode<synchronous>, transform_indices = @transform_7, window_bounds = array<i64: 16, 16>}, {pipeline_mode = #tpu.pipeline_mode<synchronous>, transform_indices = @transform_8, window_bounds = array<i64: 2, 1>}, {pipeline_mode = #tpu.pipeline_mode<synchronous>, transform_indices = @transform_9, window_bounds = array<i64: 2, 32>}, {pipeline_mode = #tpu.pipeline_mode<synchronous>, transform_indices = @transform_10, window_bounds = array<i64: 32, 32>}, {pipeline_mode = #tpu.pipeline_mode<synchronous>, transform_indices = @transform_11, window_bounds = array<i64: 1, 32>}, {transform_indices = @transform_12, window_bounds = array<i64: 8, 128>}]} {
    %c0_i32 = arith.constant 0 : i32
    %0 = arith.cmpi eq, %arg1, %c0_i32 : i32
    %1 = arith.extui %0 : i1 to i32
    %c0_i32_0 = arith.constant 0 : i32
    %2 = arith.cmpi ne, %1, %c0_i32_0 : i32
    scf.if %2 {
      %cst_17 = arith.constant 0.000000e+00 : f32
      %47 = vector.broadcast %cst_17 : f32 to vector<1x1xf32>
      %c0_18 = arith.constant 0 : index
      %c0_19 = arith.constant 0 : index
      %48 = vector.load %arg15[%c0_18, %c0_19] : memref<1x1xf32, #tpu.memory_space<vmem>>, vector<1x1xf32>
      tpu.vector_store %arg15[%c0_18, %c0_19], %47 {strides = array<i32>} : memref<1x1xf32, #tpu.memory_space<vmem>>, vector<1x1xf32>,
      %cst_20 = arith.constant 0.000000e+00 : f32
      %49 = vector.broadcast %cst_20 : f32 to vector<2x32xf32>
      %c0_21 = arith.constant 0 : index
      %c0_22 = arith.constant 0 : index
      %50 = vector.load %arg16[%c0_21, %c0_22] : memref<2x32xf32, #tpu.memory_space<vmem>>, vector<2x32xf32>
      tpu.vector_store %arg16[%c0_21, %c0_22], %49 {strides = array<i32>} : memref<2x32xf32, #tpu.memory_space<vmem>>, vector<2x32xf32>,
    } else {
    }
    %c0 = arith.constant 0 : index
    %c0_1 = arith.constant 0 : index
    %3 = vector.load %arg2[%c0, %c0_1] : memref<16x32xbf16, #tpu.memory_space<vmem>>, vector<16x32xbf16>
    %4 = arith.extf %3 : vector<16x32xbf16> to vector<16x32xf32>
    %cst = arith.constant dense<0xFF800000> : vector<16xf32>
    %5 = vector.multi_reduction <maximumf>, %4, %cst [1] : vector<16x32xf32> to vector<16xf32>
    %6 = vector.shape_cast %5 : vector<16xf32> to vector<16x1xf32>
    %7 = vector.broadcast %6 : vector<16x1xf32> to vector<16x32xf32>
    %8 = arith.subf %4, %7 : vector<16x32xf32>
    %9 = math.exp %8 : vector<16x32xf32>
    %cst_2 = arith.constant dense<0.000000e+00> : vector<16xf32>
    %10 = vector.multi_reduction <add>, %9, %cst_2 [1] : vector<16x32xf32> to vector<16xf32>
    %11 = vector.shape_cast %10 : vector<16xf32> to vector<16x1xf32>
    %12 = math.log %11 : vector<16x1xf32>
    %13 = arith.addf %6, %12 : vector<16x1xf32>
    %14 = tpu.iota {dimensions = array<i32: 1>} : vector<16x32xi32>
    %c0_3 = arith.constant 0 : index
    %c0_4 = arith.constant 0 : index
    %15 = vector.load %arg3[%c0_3, %c0_4] : memref<16x1xi32, #tpu.memory_space<vmem>>, vector<16x1xi32>
    %16 = vector.broadcast %15 : vector<16x1xi32> to vector<16x32xi32>
    %17 = arith.cmpi eq, %14, %16 : vector<16x32xi32>
    %cst_5 = arith.constant 0.000000e+00 : f32
    %18 = vector.broadcast %cst_5 : f32 to vector<16x32xf32>
    %19 = arith.select %17, %4, %18 : vector<16x32xi1>, vector<16x32xf32>
    %cst_6 = arith.constant dense<0.000000e+00> : vector<16xf32>
    %20 = vector.multi_reduction <add>, %19, %cst_6 [1] : vector<16x32xf32> to vector<16xf32>
    %21 = vector.shape_cast %20 : vector<16xf32> to vector<16x1xf32>
    %c1_i32 = arith.constant 1 : i32
    %22 = arith.muli %arg0, %c1_i32 : i32
    %23 = arith.addi %22, %arg1 : i32
    %c16_i32 = arith.constant 16 : i32
    %24 = arith.muli %23, %c16_i32 : i32
    %25 = tpu.iota {dimensions = array<i32: 0>} : vector<16x1xi32>
    %26 = vector.broadcast %24 : i32 to vector<16x1xi32>
    %27 = arith.addi %26, %25 : vector<16x1xi32>
    %c12_i32 = arith.constant 12 : i32
    %28 = vector.broadcast %c12_i32 : i32 to vector<16x1xi32>
    %29 = arith.cmpi slt, %27, %28 : vector<16x1xi32>
    %30 = arith.extui %29 : vector<16x1xi1> to vector<16x1xi32>
    %31 = arith.sitofp %30 : vector<16x1xi32> to vector<16x1xf32>
    %c0_7 = arith.constant 0 : index
    %c0_8 = arith.constant 0 : index
    %32 = vector.load %arg15[%c0_7, %c0_8] : memref<1x1xf32, #tpu.memory_space<vmem>>, vector<1x1xf32>
    %33 = arith.subf %13, %21 : vector<16x1xf32>
    %34 = arith.mulf %33, %31 : vector<16x1xf32>
    %cst_9 = arith.constant dense<0.000000e+00> : vector<1xf32>
    %35 = vector.multi_reduction <add>, %34, %cst_9 [0] : vector<16x1xf32> to vector<1xf32>
    %36 = vector.shape_cast %35 : vector<1xf32> to vector<1x1xf32>
    %37 = arith.addf %32, %36 : vector<1x1xf32>
    %c0_10 = arith.constant 0 : index
    %c0_11 = arith.constant 0 : index
    %38 = vector.load %arg15[%c0_10, %c0_11] : memref<1x1xf32, #tpu.memory_space<vmem>>, vector<1x1xf32>
    tpu.vector_store %arg15[%c0_10, %c0_11], %37 {strides = array<i32>} : memref<1x1xf32, #tpu.memory_space<vmem>>, vector<1x1xf32>,
    %c0_i32_12 = arith.constant 0 : i32
    %39 = arith.cmpi eq, %arg0, %c0_i32_12 : i32
    %c1_i32_13 = arith.constant 1 : i32
    %40 = arith.cmpi slt, %arg1, %c1_i32_13 : i32
    %41 = arith.andi %39, %40 : i1
    %42 = arith.extui %41 : i1 to i32
    %c0_i32_14 = arith.constant 0 : i32
    %43 = arith.cmpi ne, %42, %c0_i32_14 : i32
    scf.if %43 {
      %c0_17 = arith.constant 0 : index
      %c0_18 = arith.constant 0 : index
      %47 = vector.load %arg4[%c0_17, %c0_18] : memref<16x32xbf16, #tpu.memory_space<vmem>>, vector<16x32xbf16>
      %48 = arith.extf %47 : vector<16x32xbf16> to vector<16x32xf32>
      %cst_19 = arith.constant dense<0xFF800000> : vector<16xf32>
      %49 = vector.multi_reduction <maximumf>, %48, %cst_19 [1] : vector<16x32xf32> to vector<16xf32>
      %50 = vector.shape_cast %49 : vector<16xf32> to vector<16x1xf32>
      %51 = tpu.iota {dimensions = array<i32: 1>} : vector<16x32xi32>
      %52 = vector.broadcast %50 : vector<16x1xf32> to vector<16x32xf32>
      %53 = arith.cmpf oeq, %48, %52 : vector<16x32xf32>
      %c32_i32 = arith.constant 32 : i32
      %54 = vector.broadcast %c32_i32 : i32 to vector<16x32xi32>
      %55 = arith.select %53, %51, %54 : vector<16x32xi1>, vector<16x32xi32>
      %cst_20 = arith.constant dense<2147483647> : vector<16xi32>
      %56 = vector.multi_reduction <minsi>, %55, %cst_20 [1] : vector<16x32xi32> to vector<16xi32>
      %57 = vector.shape_cast %56 : vector<16xi32> to vector<16x1xi32>
      %58 = vector.broadcast %57 : vector<16x1xi32> to vector<16x32xi32>
      %59 = arith.cmpi eq, %51, %58 : vector<16x32xi32>
      %60 = arith.extui %59 : vector<16x32xi1> to vector<16x32xi32>
      %61 = arith.sitofp %60 : vector<16x32xi32> to vector<16x32xf32>
      %62 = arith.truncf %61 : vector<16x32xf32> to vector<16x32xbf16>
      %c0_21 = arith.constant 0 : index
      %c0_22 = arith.constant 0 : index
      %63 = vector.load %arg12[%c0_21, %c0_22] : memref<32x32xbf16, #tpu.memory_space<vmem>>, vector<32x32xbf16>
      %cst_23 = arith.constant dense<0.000000e+00> : vector<16x32xf32>
      %64 = tpu.matmul %62, %63, %cst_23 {dimension_numbers = #tpu.dot_dimension_numbers<[1], [0], [0], [1], [0, 0, 1, 1], [], []>} : vector<16x32xbf16>, vector<32x32xbf16>, vector<16x32xf32> -> vector<16x32xf32>
      %c0_24 = arith.constant 0 : index
      %c0_25 = arith.constant 0 : index
      %65 = vector.load %arg16[%c0_24, %c0_25] : memref<2x32xf32, #tpu.memory_space<vmem>>, vector<2x32xf32>
      %c0_26 = arith.constant 0 : index
      %c0_27 = arith.constant 0 : index
      %66 = vector.load %arg5[%c0_26, %c0_27] : memref<2x16xf32, #tpu.memory_space<vmem>>, vector<2x16xf32>
      %cst_28 = arith.constant dense<0.000000e+00> : vector<2x32xf32>
      %67 = tpu.matmul %66, %64, %cst_28 {dimension_numbers = #tpu.dot_dimension_numbers<[1], [0], [0], [1], [0, 0, 1, 1], [], []>} : vector<2x16xf32>, vector<16x32xf32>, vector<2x32xf32> -> vector<2x32xf32>
      %68 = arith.addf %65, %67 : vector<2x32xf32>
      %c0_29 = arith.constant 0 : index
      %c0_30 = arith.constant 0 : index
      %69 = vector.load %arg16[%c0_29, %c0_30] : memref<2x32xf32, #tpu.memory_space<vmem>>, vector<2x32xf32>
      tpu.vector_store %arg16[%c0_29, %c0_30], %68 {strides = array<i32>} : memref<2x32xf32, #tpu.memory_space<vmem>>, vector<2x32xf32>,
    } else {
    }
    %c0_i32_15 = arith.constant 0 : i32
    %44 = arith.cmpi eq, %arg1, %c0_i32_15 : i32
    %45 = arith.extui %44 : i1 to i32
    %c0_i32_16 = arith.constant 0 : i32
    %46 = arith.cmpi ne, %45, %c0_i32_16 : i32
    scf.if %46 {
      %c0_17 = arith.constant 0 : index
      %c0_18 = arith.constant 0 : index
      %47 = vector.load %arg6[%c0_17, %c0_18] : memref<16x16xf32, #tpu.memory_space<vmem>>, vector<16x16xf32>
      %c0_19 = arith.constant 0 : index
      %c0_20 = arith.constant 0 : index
      %48 = vector.load %arg7[%c0_19, %c0_20] : memref<16x16xf32, #tpu.memory_space<vmem>>, vector<16x16xf32>
      %c0_21 = arith.constant 0 : index
      %c0_22 = arith.constant 0 : index
      %49 = vector.load %arg8[%c0_21, %c0_22] : memref<16x16xf32, #tpu.memory_space<vmem>>, vector<16x16xf32>
      %c0_23 = arith.constant 0 : index
      %c0_24 = arith.constant 0 : index
      %50 = vector.load %arg9[%c0_23, %c0_24] : memref<16x16xf32, #tpu.memory_space<vmem>>, vector<16x16xf32>
      %51 = arith.subf %50, %48 : vector<16x16xf32>
      %cst_25 = arith.constant 2.000000e+00 : f32
      %52 = vector.broadcast %cst_25 : f32 to vector<16x16xf32>
      %53 = arith.mulf %52, %48 : vector<16x16xf32>
      %54 = math.exp %53 : vector<16x16xf32>
      %55 = arith.subf %47, %49 : vector<16x16xf32>
      %56 = arith.mulf %55, %55 : vector<16x16xf32>
      %57 = arith.addf %54, %56 : vector<16x16xf32>
      %cst_26 = arith.constant 2.000000e+00 : f32
      %58 = vector.broadcast %cst_26 : f32 to vector<16x16xf32>
      %59 = arith.mulf %58, %50 : vector<16x16xf32>
      %60 = math.exp %59 : vector<16x16xf32>
      %cst_27 = arith.constant 2.000000e+00 : f32
      %61 = vector.broadcast %cst_27 : f32 to vector<16x16xf32>
      %62 = arith.mulf %61, %60 : vector<16x16xf32>
      %63 = arith.divf %57, %62 : vector<16x16xf32>
      %64 = arith.addf %51, %63 : vector<16x16xf32>
      %cst_28 = arith.constant 5.000000e-01 : f32
      %65 = vector.broadcast %cst_28 : f32 to vector<16x16xf32>
      %66 = arith.subf %64, %65 : vector<16x16xf32>
      %cst_29 = arith.constant dense<0.000000e+00> : vector<16xf32>
      %67 = vector.multi_reduction <add>, %66, %cst_29 [1] : vector<16x16xf32> to vector<16xf32>
      %68 = vector.shape_cast %67 : vector<16xf32> to vector<16x1xf32>
      %cst_30 = arith.constant dense<0.000000e+00> : vector<1xf32>
      %69 = vector.multi_reduction <add>, %68, %cst_30 [0] : vector<16x1xf32> to vector<1xf32>
      %70 = vector.shape_cast %69 : vector<1xf32> to vector<1x1xf32>
      %cst_31 = arith.constant 3.906250e-03 : f32
      %71 = vector.broadcast %cst_31 : f32 to vector<1x1xf32>
      %72 = arith.mulf %70, %71 : vector<1x1xf32>
      %c0_32 = arith.constant 0 : index
      %c0_33 = arith.constant 0 : index
      %73 = vector.load %arg16[%c0_32, %c0_33] : memref<2x32xf32, #tpu.memory_space<vmem>>, vector<2x32xf32>
      %c0_34 = arith.constant 0 : index
      %c0_35 = arith.constant 0 : index
      %74 = vector.load %arg11[%c0_34, %c0_35] : memref<2x32xf32, #tpu.memory_space<vmem>>, vector<2x32xf32>
      %75 = arith.addf %73, %74 : vector<2x32xf32>
      %76 = math.tanh %75 : vector<2x32xf32>
      %c0_36 = arith.constant 0 : index
      %c0_37 = arith.constant 0 : index
      %77 = vector.load %arg13[%c0_36, %c0_37] : memref<1x32xf32, #tpu.memory_space<vmem>>, vector<1x32xf32>
      %78 = vector.broadcast %77 : vector<1x32xf32> to vector<2x32xf32>
      %79 = arith.mulf %76, %78 : vector<2x32xf32>
      %cst_38 = arith.constant dense<0.000000e+00> : vector<2xf32>
      %80 = vector.multi_reduction <add>, %79, %cst_38 [1] : vector<2x32xf32> to vector<2xf32>
      %81 = vector.shape_cast %80 : vector<2xf32> to vector<2x1xf32>
      %82 = math.absf %81 : vector<2x1xf32>
      %cst_39 = arith.constant 0.000000e+00 : f32
      %83 = vector.broadcast %cst_39 : f32 to vector<2x1xf32>
      %84 = arith.subf %83, %82 : vector<2x1xf32>
      %85 = math.exp %84 : vector<2x1xf32>
      %cst_40 = arith.constant 1.000000e+00 : f32
      %86 = vector.broadcast %cst_40 : f32 to vector<2x1xf32>
      %87 = arith.addf %86, %85 : vector<2x1xf32>
      %88 = math.log %87 : vector<2x1xf32>
      %cst_41 = arith.constant 0.000000e+00 : f32
      %89 = vector.broadcast %cst_41 : f32 to vector<2x1xf32>
      %90 = arith.subf %89, %81 : vector<2x1xf32>
      %cst_42 = arith.constant 0.000000e+00 : f32
      %91 = vector.broadcast %cst_42 : f32 to vector<2x1xf32>
      %92 = arith.maximumf %90, %91 : vector<2x1xf32>
      %93 = arith.addf %92, %88 : vector<2x1xf32>
      %cst_43 = arith.constant 0.000000e+00 : f32
      %94 = vector.broadcast %cst_43 : f32 to vector<2x1xf32>
      %95 = arith.subf %94, %93 : vector<2x1xf32>
      %cst_44 = arith.constant -16.1180954 : f32
      %cst_45 = arith.constant -1.00000008E-7 : f32
      %96 = vector.broadcast %cst_44 : f32 to vector<2x1xf32>
      %97 = arith.maximumf %96, %95 : vector<2x1xf32>
      %98 = vector.broadcast %cst_45 : f32 to vector<2x1xf32>
      %99 = arith.minimumf %98, %97 : vector<2x1xf32>
      %cst_46 = arith.constant 0.000000e+00 : f32
      %100 = vector.broadcast %cst_46 : f32 to vector<2x1xf32>
      %101 = arith.maximumf %81, %100 : vector<2x1xf32>
      %102 = arith.addf %101, %88 : vector<2x1xf32>
      %cst_47 = arith.constant 0.000000e+00 : f32
      %103 = vector.broadcast %cst_47 : f32 to vector<2x1xf32>
      %104 = arith.subf %103, %102 : vector<2x1xf32>
      %cst_48 = arith.constant -16.1180954 : f32
      %cst_49 = arith.constant -1.00000008E-7 : f32
      %105 = vector.broadcast %cst_48 : f32 to vector<2x1xf32>
      %106 = arith.maximumf %105, %104 : vector<2x1xf32>
      %107 = vector.broadcast %cst_49 : f32 to vector<2x1xf32>
      %108 = arith.minimumf %107, %106 : vector<2x1xf32>
      %c0_50 = arith.constant 0 : index
      %c0_51 = arith.constant 0 : index
      %109 = vector.load %arg10[%c0_50, %c0_51] : memref<2x1xf32, #tpu.memory_space<vmem>>, vector<2x1xf32>
      %cst_52 = arith.constant 1.000000e+00 : f32
      %110 = vector.broadcast %cst_52 : f32 to vector<2x1xf32>
      %111 = arith.mulf %110, %109 : vector<2x1xf32>
      %112 = arith.mulf %111, %99 : vector<2x1xf32>
      %cst_53 = arith.constant 1.000000e+00 : f32
      %113 = vector.broadcast %cst_53 : f32 to vector<2x1xf32>
      %114 = arith.subf %113, %109 : vector<2x1xf32>
      %115 = arith.mulf %114, %108 : vector<2x1xf32>
      %116 = arith.addf %112, %115 : vector<2x1xf32>
      %cst_54 = arith.constant 0.000000e+00 : f32
      %117 = vector.broadcast %cst_54 : f32 to vector<2x1xf32>
      %118 = arith.subf %117, %116 : vector<2x1xf32>
      %cst_55 = arith.constant dense<0.000000e+00> : vector<1xf32>
      %119 = vector.multi_reduction <add>, %118, %cst_55 [0] : vector<2x1xf32> to vector<1xf32>
      %120 = vector.shape_cast %119 : vector<1xf32> to vector<1x1xf32>
      %cst_56 = arith.constant 5.000000e-01 : f32
      %121 = vector.broadcast %cst_56 : f32 to vector<1x1xf32>
      %122 = arith.mulf %120, %121 : vector<1x1xf32>
      %123 = tpu.iota {dimensions = array<i32: 1>} : vector<8x128xi32>
      %124 = tpu.iota {dimensions = array<i32: 0>} : vector<8x128xi32>
      %c0_i32_57 = arith.constant 0 : i32
      %125 = vector.broadcast %c0_i32_57 : i32 to vector<8x128xi32>
      %126 = arith.cmpi eq, %124, %125 : vector<8x128xi32>
      %c0_i32_58 = arith.constant 0 : i32
      %127 = vector.broadcast %c0_i32_58 : i32 to vector<8x128xi32>
      %128 = arith.cmpi eq, %123, %127 : vector<8x128xi32>
      %129 = arith.andi %126, %128 : vector<8x128xi1>
      %c0_59 = arith.constant 0 : index
      %c0_60 = arith.constant 0 : index
      %130 = vector.load %arg15[%c0_59, %c0_60] : memref<1x1xf32, #tpu.memory_space<vmem>>, vector<1x1xf32>
      %cst_61 = arith.constant 0.000000e+00 : f32
      %131 = vector.shape_cast %130 : vector<1x1xf32> to vector<1x1xf32>
      %132 = vector.broadcast %131 : vector<1x1xf32> to vector<8x128xf32>
      %133 = vector.broadcast %cst_61 : f32 to vector<8x128xf32>
      %134 = arith.select %129, %132, %133 : vector<8x128xi1>, vector<8x128xf32>
      %c1_i32_62 = arith.constant 1 : i32
      %135 = vector.broadcast %c1_i32_62 : i32 to vector<8x128xi32>
      %136 = arith.cmpi eq, %123, %135 : vector<8x128xi32>
      %137 = arith.andi %126, %136 : vector<8x128xi1>
      %138 = vector.shape_cast %72 : vector<1x1xf32> to vector<1x1xf32>
      %139 = vector.broadcast %138 : vector<1x1xf32> to vector<8x128xf32>
      %140 = arith.select %137, %139, %134 : vector<8x128xi1>, vector<8x128xf32>
      %c2_i32 = arith.constant 2 : i32
      %141 = vector.broadcast %c2_i32 : i32 to vector<8x128xi32>
      %142 = arith.cmpi eq, %123, %141 : vector<8x128xi32>
      %143 = arith.andi %126, %142 : vector<8x128xi1>
      %144 = vector.shape_cast %122 : vector<1x1xf32> to vector<1x1xf32>
      %145 = vector.broadcast %144 : vector<1x1xf32> to vector<8x128xf32>
      %146 = arith.select %143, %145, %140 : vector<8x128xi1>, vector<8x128xf32>
      %c0_63 = arith.constant 0 : index
      %c0_64 = arith.constant 0 : index
      %147 = vector.load %arg14[%c0_63, %c0_64] : memref<8x128xf32, #tpu.memory_space<vmem>>, vector<8x128xf32>
      tpu.vector_store %arg14[%c0_63, %c0_64], %146 {strides = array<i32>} : memref<8x128xf32, #tpu.memory_space<vmem>>, vector<8x128xf32>,
    } else {
    }
    return
  }
  func.func @transform_0(%arg0: i32, %arg1: i32) -> (i32, i32) {
    %c1_i32 = arith.constant 1 : i32
    %0 = arith.muli %arg0, %c1_i32 : i32
    %1 = arith.addi %0, %arg1 : i32
    %c0_i32 = arith.constant 0 : i32
    %2 = arith.minsi %1, %c0_i32 : i32
    %c0_i32_0 = arith.constant 0 : i32
    %c0_i32_1 = arith.constant 0 : i32
    return %2, %c0_i32_0 : i32, i32
  }
  func.func @transform_1(%arg0: i32, %arg1: i32) -> (i32, i32) {
    %c1_i32 = arith.constant 1 : i32
    %0 = arith.muli %arg0, %c1_i32 : i32
    %1 = arith.addi %0, %arg1 : i32
    %c0_i32 = arith.constant 0 : i32
    %2 = arith.minsi %1, %c0_i32 : i32
    %c0_i32_0 = arith.constant 0 : i32
    %c0_i32_1 = arith.constant 0 : i32
    return %2, %c0_i32_0 : i32, i32
  }
  func.func @transform_2(%arg0: i32, %arg1: i32) -> (i32, i32) {
    %c1_i32 = arith.constant 1 : i32
    %0 = arith.muli %arg0, %c1_i32 : i32
    %1 = arith.addi %arg1, %0 : i32
    %c0_i32 = arith.constant 0 : i32
    %2 = arith.minsi %1, %c0_i32 : i32
    %c0_i32_0 = arith.constant 0 : i32
    %c0_i32_1 = arith.constant 0 : i32
    return %2, %c0_i32_0 : i32, i32
  }
  func.func @transform_3(%arg0: i32, %arg1: i32) -> (i32, i32) {
    %c1_i32 = arith.constant 1 : i32
    %0 = arith.muli %arg0, %c1_i32 : i32
    %1 = arith.addi %arg1, %0 : i32
    %c0_i32 = arith.constant 0 : i32
    %2 = arith.minsi %1, %c0_i32 : i32
    %c0_i32_0 = arith.constant 0 : i32
    %c0_i32_1 = arith.constant 0 : i32
    return %c0_i32_0, %2 : i32, i32
  }
  func.func @transform_4(%arg0: i32, %arg1: i32) -> (i32, i32) {
    %c0_i32 = arith.constant 0 : i32
    %c0_i32_0 = arith.constant 0 : i32
    %c0_i32_1 = arith.constant 0 : i32
    return %c0_i32, %c0_i32_0 : i32, i32
  }
  func.func @transform_5(%arg0: i32, %arg1: i32) -> (i32, i32) {
    %c0_i32 = arith.constant 0 : i32
    %c0_i32_0 = arith.constant 0 : i32
    %c0_i32_1 = arith.constant 0 : i32
    return %c0_i32, %c0_i32_0 : i32, i32
  }
  func.func @transform_6(%arg0: i32, %arg1: i32) -> (i32, i32) {
    %c0_i32 = arith.constant 0 : i32
    %c0_i32_0 = arith.constant 0 : i32
    %c0_i32_1 = arith.constant 0 : i32
    return %c0_i32, %c0_i32_0 : i32, i32
  }
  func.func @transform_7(%arg0: i32, %arg1: i32) -> (i32, i32) {
    %c0_i32 = arith.constant 0 : i32
    %c0_i32_0 = arith.constant 0 : i32
    %c0_i32_1 = arith.constant 0 : i32
    return %c0_i32, %c0_i32_0 : i32, i32
  }
  func.func @transform_8(%arg0: i32, %arg1: i32) -> (i32, i32) {
    %c0_i32 = arith.constant 0 : i32
    %c0_i32_0 = arith.constant 0 : i32
    %c0_i32_1 = arith.constant 0 : i32
    return %c0_i32, %c0_i32_0 : i32, i32
  }
  func.func @transform_9(%arg0: i32, %arg1: i32) -> (i32, i32) {
    %c0_i32 = arith.constant 0 : i32
    %c0_i32_0 = arith.constant 0 : i32
    %c0_i32_1 = arith.constant 0 : i32
    return %c0_i32, %c0_i32_0 : i32, i32
  }
  func.func @transform_10(%arg0: i32, %arg1: i32) -> (i32, i32) {
    %c0_i32 = arith.constant 0 : i32
    %c0_i32_0 = arith.constant 0 : i32
    %c0_i32_1 = arith.constant 0 : i32
    return %c0_i32, %c0_i32_0 : i32, i32
  }
  func.func @transform_11(%arg0: i32, %arg1: i32) -> (i32, i32) {
    %c0_i32 = arith.constant 0 : i32
    %c0_i32_0 = arith.constant 0 : i32
    %c0_i32_1 = arith.constant 0 : i32
    return %c0_i32, %c0_i32_0 : i32, i32
  }
  func.func @transform_12(%arg0: i32, %arg1: i32) -> (i32, i32) {
    %c0_i32 = arith.constant 0 : i32
    %c0_i32_0 = arith.constant 0 : i32
    return %arg0, %c0_i32 : i32, i32
  }
}

module attributes {stable_mosaic.version = 11 : i64} {
  func.func @kernel(%arg0: i32, %arg1: i32, %arg2: memref<16x32xbf16, #tpu.memory_space<vmem>>, %arg3: memref<16x1xi32, #tpu.memory_space<vmem>>, %arg4: memref<16x32xbf16, #tpu.memory_space<vmem>>, %arg5: memref<2x16xf32, #tpu.memory_space<vmem>>, %arg6: memref<16x16xf32, #tpu.memory_space<vmem>>, %arg7: memref<16x16xf32, #tpu.memory_space<vmem>>, %arg8: memref<16x16xf32, #tpu.memory_space<vmem>>, %arg9: memref<16x16xf32, #tpu.memory_space<vmem>>, %arg10: memref<2x1xf32, #tpu.memory_space<vmem>>, %arg11: memref<2x32xf32, #tpu.memory_space<vmem>>, %arg12: memref<32x32xbf16, #tpu.memory_space<vmem>>, %arg13: memref<1x32xf32, #tpu.memory_space<vmem>>, %arg14: memref<8x128xf32, #tpu.memory_space<vmem>>, %arg15: memref<1x1xf32, #tpu.memory_space<vmem>>, %arg16: memref<2x32xf32, #tpu.memory_space<vmem>>) attributes {dimension_semantics = [#tpu.dimension_semantics<parallel>, #tpu.dimension_semantics<arbitrary>], iteration_bounds = array<i64: 2, 1>, scalar_prefetch = 0 : i64, scratch_operands = 2 : i64, tpu.core_type = #tpu.core_type<tc>, window_params = [{transform_indices = @transform_0, window_bounds = array<i64: 16, 32>}, {transform_indices = @transform_1, window_bounds = array<i64: 16, 1>}, {transform_indices = @transform_2, window_bounds = array<i64: 16, 32>}, {transform_indices = @transform_3, window_bounds = array<i64: 2, 16>}, {pipeline_mode = #tpu.pipeline_mode<synchronous>, transform_indices = @transform_4, window_bounds = array<i64: 16, 16>}, {pipeline_mode = #tpu.pipeline_mode<synchronous>, transform_indices = @transform_5, window_bounds = array<i64: 16, 16>}, {pipeline_mode = #tpu.pipeline_mode<synchronous>, transform_indices = @transform_6, window_bounds = array<i64: 16, 16>}, {pipeline_mode = #tpu.pipeline_mode<synchronous>, transform_indices = @transform_7, window_bounds = array<i64: 16, 16>}, {pipeline_mode = #tpu.pipeline_mode<synchronous>, transform_indices = @transform_8, window_bounds = array<i64: 2, 1>}, {pipeline_mode = #tpu.pipeline_mode<synchronous>, transform_indices = @transform_9, window_bounds = array<i64: 2, 32>}, {pipeline_mode = #tpu.pipeline_mode<synchronous>, transform_indices = @transform_10, window_bounds = array<i64: 32, 32>}, {pipeline_mode = #tpu.pipeline_mode<synchronous>, transform_indices = @transform_11, window_bounds = array<i64: 1, 32>}, {transform_indices = @transform_12, window_bounds = array<i64: 8, 128>}]} {
    %c0_i32 = arith.constant 0 : i32
    %0 = arith.cmpi eq, %arg1, %c0_i32 : i32
    %1 = arith.extui %0 : i1 to i32
    %c0_i32_0 = arith.constant 0 : i32
    %2 = arith.cmpi ne, %1, %c0_i32_0 : i32
    scf.if %2 {
      %cst_17 = arith.constant 0.000000e+00 : f32
      %47 = vector.broadcast %cst_17 : f32 to vector<1x1xf32>
      %c0_18 = arith.constant 0 : index
      %c0_19 = arith.constant 0 : index
      %48 = vector.load %arg15[%c0_18, %c0_19] : memref<1x1xf32, #tpu.memory_space<vmem>>, vector<1x1xf32>
      tpu.vector_store %arg15[%c0_18, %c0_19], %47 {strides = array<i32>} : memref<1x1xf32, #tpu.memory_space<vmem>>, vector<1x1xf32>,
      %cst_20 = arith.constant 0.000000e+00 : f32
      %49 = vector.broadcast %cst_20 : f32 to vector<2x32xf32>
      %c0_21 = arith.constant 0 : index
      %c0_22 = arith.constant 0 : index
      %50 = vector.load %arg16[%c0_21, %c0_22] : memref<2x32xf32, #tpu.memory_space<vmem>>, vector<2x32xf32>
      tpu.vector_store %arg16[%c0_21, %c0_22], %49 {strides = array<i32>} : memref<2x32xf32, #tpu.memory_space<vmem>>, vector<2x32xf32>,
    } else {
    }
    %c0 = arith.constant 0 : index
    %c0_1 = arith.constant 0 : index
    %3 = vector.load %arg2[%c0, %c0_1] : memref<16x32xbf16, #tpu.memory_space<vmem>>, vector<16x32xbf16>
    %4 = arith.extf %3 : vector<16x32xbf16> to vector<16x32xf32>
    %cst = arith.constant dense<0xFF800000> : vector<16xf32>
    %5 = vector.multi_reduction <maximumf>, %4, %cst [1] : vector<16x32xf32> to vector<16xf32>
    %6 = vector.shape_cast %5 : vector<16xf32> to vector<16x1xf32>
    %7 = vector.broadcast %6 : vector<16x1xf32> to vector<16x32xf32>
    %8 = arith.subf %4, %7 : vector<16x32xf32>
    %9 = math.exp %8 : vector<16x32xf32>
    %cst_2 = arith.constant dense<0.000000e+00> : vector<16xf32>
    %10 = vector.multi_reduction <add>, %9, %cst_2 [1] : vector<16x32xf32> to vector<16xf32>
    %11 = vector.shape_cast %10 : vector<16xf32> to vector<16x1xf32>
    %12 = math.log %11 : vector<16x1xf32>
    %13 = arith.addf %6, %12 : vector<16x1xf32>
    %14 = tpu.iota {dimensions = array<i32: 1>} : vector<16x32xi32>
    %c0_3 = arith.constant 0 : index
    %c0_4 = arith.constant 0 : index
    %15 = vector.load %arg3[%c0_3, %c0_4] : memref<16x1xi32, #tpu.memory_space<vmem>>, vector<16x1xi32>
    %16 = vector.broadcast %15 : vector<16x1xi32> to vector<16x32xi32>
    %17 = arith.cmpi eq, %14, %16 : vector<16x32xi32>
    %cst_5 = arith.constant 0.000000e+00 : f32
    %18 = vector.broadcast %cst_5 : f32 to vector<16x32xf32>
    %19 = arith.select %17, %4, %18 : vector<16x32xi1>, vector<16x32xf32>
    %cst_6 = arith.constant dense<0.000000e+00> : vector<16xf32>
    %20 = vector.multi_reduction <add>, %19, %cst_6 [1] : vector<16x32xf32> to vector<16xf32>
    %21 = vector.shape_cast %20 : vector<16xf32> to vector<16x1xf32>
    %c1_i32 = arith.constant 1 : i32
    %22 = arith.muli %arg0, %c1_i32 : i32
    %23 = arith.addi %22, %arg1 : i32
    %c16_i32 = arith.constant 16 : i32
    %24 = arith.muli %23, %c16_i32 : i32
    %25 = tpu.iota {dimensions = array<i32: 0>} : vector<16x1xi32>
    %26 = vector.broadcast %24 : i32 to vector<16x1xi32>
    %27 = arith.addi %26, %25 : vector<16x1xi32>
    %c12_i32 = arith.constant 12 : i32
    %28 = vector.broadcast %c12_i32 : i32 to vector<16x1xi32>
    %29 = arith.cmpi slt, %27, %28 : vector<16x1xi32>
    %30 = arith.extui %29 : vector<16x1xi1> to vector<16x1xi32>
    %31 = arith.sitofp %30 : vector<16x1xi32> to vector<16x1xf32>
    %c0_7 = arith.constant 0 : index
    %c0_8 = arith.constant 0 : index
    %32 = vector.load %arg15[%c0_7, %c0_8] : memref<1x1xf32, #tpu.memory_space<vmem>>, vector<1x1xf32>
    %33 = arith.subf %13, %21 : vector<16x1xf32>
    %34 = arith.mulf %33, %31 : vector<16x1xf32>
    %cst_9 = arith.constant dense<0.000000e+00> : vector<1xf32>
    %35 = vector.multi_reduction <add>, %34, %cst_9 [0] : vector<16x1xf32> to vector<1xf32>
    %36 = vector.shape_cast %35 : vector<1xf32> to vector<1x1xf32>
    %37 = arith.addf %32, %36 : vector<1x1xf32>
    %c0_10 = arith.constant 0 : index
    %c0_11 = arith.constant 0 : index
    %38 = vector.load %arg15[%c0_10, %c0_11] : memref<1x1xf32, #tpu.memory_space<vmem>>, vector<1x1xf32>
    tpu.vector_store %arg15[%c0_10, %c0_11], %37 {strides = array<i32>} : memref<1x1xf32, #tpu.memory_space<vmem>>, vector<1x1xf32>,
    %c0_i32_12 = arith.constant 0 : i32
    %39 = arith.cmpi eq, %arg0, %c0_i32_12 : i32
    %c1_i32_13 = arith.constant 1 : i32
    %40 = arith.cmpi slt, %arg1, %c1_i32_13 : i32
    %41 = arith.andi %39, %40 : i1
    %42 = arith.extui %41 : i1 to i32
    %c0_i32_14 = arith.constant 0 : i32
    %43 = arith.cmpi ne, %42, %c0_i32_14 : i32
    scf.if %43 {
      %c0_17 = arith.constant 0 : index
      %c0_18 = arith.constant 0 : index
      %47 = vector.load %arg4[%c0_17, %c0_18] : memref<16x32xbf16, #tpu.memory_space<vmem>>, vector<16x32xbf16>
      %48 = arith.extf %47 : vector<16x32xbf16> to vector<16x32xf32>
      %cst_19 = arith.constant dense<0xFF800000> : vector<16xf32>
      %49 = vector.multi_reduction <maximumf>, %48, %cst_19 [1] : vector<16x32xf32> to vector<16xf32>
      %50 = vector.shape_cast %49 : vector<16xf32> to vector<16x1xf32>
      %51 = tpu.iota {dimensions = array<i32: 1>} : vector<16x32xi32>
      %52 = vector.broadcast %50 : vector<16x1xf32> to vector<16x32xf32>
      %53 = arith.cmpf oeq, %48, %52 : vector<16x32xf32>
      %c32_i32 = arith.constant 32 : i32
      %54 = vector.broadcast %c32_i32 : i32 to vector<16x32xi32>
      %55 = arith.select %53, %51, %54 : vector<16x32xi1>, vector<16x32xi32>
      %cst_20 = arith.constant dense<2147483647> : vector<16xi32>
      %56 = vector.multi_reduction <minsi>, %55, %cst_20 [1] : vector<16x32xi32> to vector<16xi32>
      %57 = vector.shape_cast %56 : vector<16xi32> to vector<16x1xi32>
      %58 = vector.broadcast %57 : vector<16x1xi32> to vector<16x32xi32>
      %59 = arith.cmpi eq, %51, %58 : vector<16x32xi32>
      %60 = arith.extui %59 : vector<16x32xi1> to vector<16x32xi32>
      %61 = arith.sitofp %60 : vector<16x32xi32> to vector<16x32xf32>
      %62 = arith.truncf %61 : vector<16x32xf32> to vector<16x32xbf16>
      %c0_21 = arith.constant 0 : index
      %c0_22 = arith.constant 0 : index
      %63 = vector.load %arg12[%c0_21, %c0_22] : memref<32x32xbf16, #tpu.memory_space<vmem>>, vector<32x32xbf16>
      %cst_23 = arith.constant dense<0.000000e+00> : vector<16x32xf32>
      %64 = tpu.matmul %62, %63, %cst_23 {dimension_numbers = #tpu.dot_dimension_numbers<[1], [0], [0], [1], [0, 0, 1, 1], [], []>} : vector<16x32xbf16>, vector<32x32xbf16>, vector<16x32xf32> -> vector<16x32xf32>
      %c0_24 = arith.constant 0 : index
      %c0_25 = arith.constant 0 : index
      %65 = vector.load %arg16[%c0_24, %c0_25] : memref<2x32xf32, #tpu.memory_space<vmem>>, vector<2x32xf32>
      %c0_26 = arith.constant 0 : index
      %c0_27 = arith.constant 0 : index
      %66 = vector.load %arg5[%c0_26, %c0_27] : memref<2x16xf32, #tpu.memory_space<vmem>>, vector<2x16xf32>
      %cst_28 = arith.constant dense<0.000000e+00> : vector<2x32xf32>
      %67 = tpu.matmul %66, %64, %cst_28 {dimension_numbers = #tpu.dot_dimension_numbers<[1], [0], [0], [1], [0, 0, 1, 1], [], []>} : vector<2x16xf32>, vector<16x32xf32>, vector<2x32xf32> -> vector<2x32xf32>
      %68 = arith.addf %65, %67 : vector<2x32xf32>
      %c0_29 = arith.constant 0 : index
      %c0_30 = arith.constant 0 : index
      %69 = vector.load %arg16[%c0_29, %c0_30] : memref<2x32xf32, #tpu.memory_space<vmem>>, vector<2x32xf32>
      tpu.vector_store %arg16[%c0_29, %c0_30], %68 {strides = array<i32>} : memref<2x32xf32, #tpu.memory_space<vmem>>, vector<2x32xf32>,
    } else {
    }
    %c0_i32_15 = arith.constant 0 : i32
    %44 = arith.cmpi eq, %arg1, %c0_i32_15 : i32
    %45 = arith.extui %44 : i1 to i32
    %c0_i32_16 = arith.constant 0 : i32
    %46 = arith.cmpi ne, %45, %c0_i32_16 : i32
    scf.if %46 {
      %c0_17 = arith.constant 0 : index
      %c0_18 = arith.constant 0 : index
      %47 = vector.load %arg6[%c0_17, %c0_18] : memref<16x16xf32, #tpu.memory_space<vmem>>, vector<16x16xf32>
      %c0_19 = arith.constant 0 : index
      %c0_20 = arith.constant 0 : index
      %48 = vector.load %arg7[%c0_19, %c0_20] : memref<16x16xf32, #tpu.memory_space<vmem>>, vector<16x16xf32>
      %c0_21 = arith.constant 0 : index
      %c0_22 = arith.constant 0 : index
      %49 = vector.load %arg8[%c0_21, %c0_22] : memref<16x16xf32, #tpu.memory_space<vmem>>, vector<16x16xf32>
      %c0_23 = arith.constant 0 : index
      %c0_24 = arith.constant 0 : index
      %50 = vector.load %arg9[%c0_23, %c0_24] : memref<16x16xf32, #tpu.memory_space<vmem>>, vector<16x16xf32>
      %51 = arith.subf %50, %48 : vector<16x16xf32>
      %cst_25 = arith.constant 2.000000e+00 : f32
      %52 = vector.broadcast %cst_25 : f32 to vector<16x16xf32>
      %53 = arith.mulf %52, %48 : vector<16x16xf32>
      %54 = math.exp %53 : vector<16x16xf32>
      %55 = arith.subf %47, %49 : vector<16x16xf32>
      %56 = arith.mulf %55, %55 : vector<16x16xf32>
      %57 = arith.addf %54, %56 : vector<16x16xf32>
      %cst_26 = arith.constant 2.000000e+00 : f32
      %58 = vector.broadcast %cst_26 : f32 to vector<16x16xf32>
      %59 = arith.mulf %58, %50 : vector<16x16xf32>
      %60 = math.exp %59 : vector<16x16xf32>
      %cst_27 = arith.constant 2.000000e+00 : f32
      %61 = vector.broadcast %cst_27 : f32 to vector<16x16xf32>
      %62 = arith.mulf %61, %60 : vector<16x16xf32>
      %63 = arith.divf %57, %62 : vector<16x16xf32>
      %64 = arith.addf %51, %63 : vector<16x16xf32>
      %cst_28 = arith.constant 5.000000e-01 : f32
      %65 = vector.broadcast %cst_28 : f32 to vector<16x16xf32>
      %66 = arith.subf %64, %65 : vector<16x16xf32>
      %cst_29 = arith.constant dense<0.000000e+00> : vector<16xf32>
      %67 = vector.multi_reduction <add>, %66, %cst_29 [1] : vector<16x16xf32> to vector<16xf32>
      %68 = vector.shape_cast %67 : vector<16xf32> to vector<16x1xf32>
      %cst_30 = arith.constant dense<0.000000e+00> : vector<1xf32>
      %69 = vector.multi_reduction <add>, %68, %cst_30 [0] : vector<16x1xf32> to vector<1xf32>
      %70 = vector.shape_cast %69 : vector<1xf32> to vector<1x1xf32>
      %cst_31 = arith.constant 3.906250e-03 : f32
      %71 = vector.broadcast %cst_31 : f32 to vector<1x1xf32>
      %72 = arith.mulf %70, %71 : vector<1x1xf32>
      %c0_32 = arith.constant 0 : index
      %c0_33 = arith.constant 0 : index
      %73 = vector.load %arg16[%c0_32, %c0_33] : memref<2x32xf32, #tpu.memory_space<vmem>>, vector<2x32xf32>
      %c0_34 = arith.constant 0 : index
      %c0_35 = arith.constant 0 : index
      %74 = vector.load %arg11[%c0_34, %c0_35] : memref<2x32xf32, #tpu.memory_space<vmem>>, vector<2x32xf32>
      %75 = arith.addf %73, %74 : vector<2x32xf32>
      %76 = math.tanh %75 : vector<2x32xf32>
      %c0_36 = arith.constant 0 : index
      %c0_37 = arith.constant 0 : index
      %77 = vector.load %arg13[%c0_36, %c0_37] : memref<1x32xf32, #tpu.memory_space<vmem>>, vector<1x32xf32>
      %78 = vector.broadcast %77 : vector<1x32xf32> to vector<2x32xf32>
      %79 = arith.mulf %76, %78 : vector<2x32xf32>
      %cst_38 = arith.constant dense<0.000000e+00> : vector<2xf32>
      %80 = vector.multi_reduction <add>, %79, %cst_38 [1] : vector<2x32xf32> to vector<2xf32>
      %81 = vector.shape_cast %80 : vector<2xf32> to vector<2x1xf32>
      %82 = math.absf %81 : vector<2x1xf32>
      %cst_39 = arith.constant 0.000000e+00 : f32
      %83 = vector.broadcast %cst_39 : f32 to vector<2x1xf32>
      %84 = arith.subf %83, %82 : vector<2x1xf32>
      %85 = math.exp %84 : vector<2x1xf32>
      %cst_40 = arith.constant 1.000000e+00 : f32
      %86 = vector.broadcast %cst_40 : f32 to vector<2x1xf32>
      %87 = arith.addf %86, %85 : vector<2x1xf32>
      %88 = math.log %87 : vector<2x1xf32>
      %cst_41 = arith.constant 0.000000e+00 : f32
      %89 = vector.broadcast %cst_41 : f32 to vector<2x1xf32>
      %90 = arith.subf %89, %81 : vector<2x1xf32>
      %cst_42 = arith.constant 0.000000e+00 : f32
      %91 = vector.broadcast %cst_42 : f32 to vector<2x1xf32>
      %92 = arith.maximumf %90, %91 : vector<2x1xf32>
      %93 = arith.addf %92, %88 : vector<2x1xf32>
      %cst_43 = arith.constant 0.000000e+00 : f32
      %94 = vector.broadcast %cst_43 : f32 to vector<2x1xf32>
      %95 = arith.subf %94, %93 : vector<2x1xf32>
      %cst_44 = arith.constant -16.1180954 : f32
      %cst_45 = arith.constant -1.00000008E-7 : f32
      %96 = vector.broadcast %cst_44 : f32 to vector<2x1xf32>
      %97 = arith.maximumf %96, %95 : vector<2x1xf32>
      %98 = vector.broadcast %cst_45 : f32 to vector<2x1xf32>
      %99 = arith.minimumf %98, %97 : vector<2x1xf32>
      %cst_46 = arith.constant 0.000000e+00 : f32
      %100 = vector.broadcast %cst_46 : f32 to vector<2x1xf32>
      %101 = arith.maximumf %81, %100 : vector<2x1xf32>
      %102 = arith.addf %101, %88 : vector<2x1xf32>
      %cst_47 = arith.constant 0.000000e+00 : f32
      %103 = vector.broadcast %cst_47 : f32 to vector<2x1xf32>
      %104 = arith.subf %103, %102 : vector<2x1xf32>
      %cst_48 = arith.constant -16.1180954 : f32
      %cst_49 = arith.constant -1.00000008E-7 : f32
      %105 = vector.broadcast %cst_48 : f32 to vector<2x1xf32>
      %106 = arith.maximumf %105, %104 : vector<2x1xf32>
      %107 = vector.broadcast %cst_49 : f32 to vector<2x1xf32>
      %108 = arith.minimumf %107, %106 : vector<2x1xf32>
      %c0_50 = arith.constant 0 : index
      %c0_51 = arith.constant 0 : index
      %109 = vector.load %arg10[%c0_50, %c0_51] : memref<2x1xf32, #tpu.memory_space<vmem>>, vector<2x1xf32>
      %cst_52 = arith.constant 1.000000e+00 : f32
      %110 = vector.broadcast %cst_52 : f32 to vector<2x1xf32>
      %111 = arith.mulf %110, %109 : vector<2x1xf32>
      %112 = arith.mulf %111, %99 : vector<2x1xf32>
      %cst_53 = arith.constant 1.000000e+00 : f32
      %113 = vector.broadcast %cst_53 : f32 to vector<2x1xf32>
      %114 = arith.subf %113, %109 : vector<2x1xf32>
      %115 = arith.mulf %114, %108 : vector<2x1xf32>
      %116 = arith.addf %112, %115 : vector<2x1xf32>
      %cst_54 = arith.constant 0.000000e+00 : f32
      %117 = vector.broadcast %cst_54 : f32 to vector<2x1xf32>
      %118 = arith.subf %117, %116 : vector<2x1xf32>
      %cst_55 = arith.constant dense<0.000000e+00> : vector<1xf32>
      %119 = vector.multi_reduction <add>, %118, %cst_55 [0] : vector<2x1xf32> to vector<1xf32>
      %120 = vector.shape_cast %119 : vector<1xf32> to vector<1x1xf32>
      %cst_56 = arith.constant 5.000000e-01 : f32
      %121 = vector.broadcast %cst_56 : f32 to vector<1x1xf32>
      %122 = arith.mulf %120, %121 : vector<1x1xf32>
      %123 = tpu.iota {dimensions = array<i32: 1>} : vector<8x128xi32>
      %124 = tpu.iota {dimensions = array<i32: 0>} : vector<8x128xi32>
      %c0_i32_57 = arith.constant 0 : i32
      %125 = vector.broadcast %c0_i32_57 : i32 to vector<8x128xi32>
      %126 = arith.cmpi eq, %124, %125 : vector<8x128xi32>
      %c0_i32_58 = arith.constant 0 : i32
      %127 = vector.broadcast %c0_i32_58 : i32 to vector<8x128xi32>
      %128 = arith.cmpi eq, %123, %127 : vector<8x128xi32>
      %129 = arith.andi %126, %128 : vector<8x128xi1>
      %c0_59 = arith.constant 0 : index
      %c0_60 = arith.constant 0 : index
      %130 = vector.load %arg15[%c0_59, %c0_60] : memref<1x1xf32, #tpu.memory_space<vmem>>, vector<1x1xf32>
      %cst_61 = arith.constant 0.000000e+00 : f32
      %131 = vector.shape_cast %130 : vector<1x1xf32> to vector<1x1xf32>
      %132 = vector.broadcast %131 : vector<1x1xf32> to vector<8x128xf32>
      %133 = vector.broadcast %cst_61 : f32 to vector<8x128xf32>
      %134 = arith.select %129, %132, %133 : vector<8x128xi1>, vector<8x128xf32>
      %c1_i32_62 = arith.constant 1 : i32
      %135 = vector.broadcast %c1_i32_62 : i32 to vector<8x128xi32>
      %136 = arith.cmpi eq, %123, %135 : vector<8x128xi32>
      %137 = arith.andi %126, %136 : vector<8x128xi1>
      %138 = vector.shape_cast %72 : vector<1x1xf32> to vector<1x1xf32>
      %139 = vector.broadcast %138 : vector<1x1xf32> to vector<8x128xf32>
      %140 = arith.select %137, %139, %134 : vector<8x128xi1>, vector<8x128xf32>
      %c2_i32 = arith.constant 2 : i32
      %141 = vector.broadcast %c2_i32 : i32 to vector<8x128xi32>
      %142 = arith.cmpi eq, %123, %141 : vector<8x128xi32>
      %143 = arith.andi %126, %142 : vector<8x128xi1>
      %144 = vector.shape_cast %122 : vector<1x1xf32> to vector<1x1xf32>
      %145 = vector.broadcast %144 : vector<1x1xf32> to vector<8x128xf32>
      %146 = arith.select %143, %145, %140 : vector<8x128xi1>, vector<8x128xf32>
      %c0_63 = arith.constant 0 : index
      %c0_64 = arith.constant 0 : index
      %147 = vector.load %arg14[%c0_63, %c0_64] : memref<8x128xf32, #tpu.memory_space<vmem>>, vector<8x128xf32>
      tpu.vector_store %arg14[%c0_63, %c0_64], %146 {strides = array<i32>} : memref<8x128xf32, #tpu.memory_space<vmem>>, vector<8x128xf32>,
    } else {
    }
    return
  }
  func.func @transform_0(%arg0: i32, %arg1: i32) -> (i32, i32) {
    %c1_i32 = arith.constant 1 : i32
    %0 = arith.muli %arg0, %c1_i32 : i32
    %1 = arith.addi %0, %arg1 : i32
    %c0_i32 = arith.constant 0 : i32
    %2 = arith.minsi %1, %c0_i32 : i32
    %c0_i32_0 = arith.constant 0 : i32
    %c0_i32_1 = arith.constant 0 : i32
    return %2, %c0_i32_0 : i32, i32
  }
  func.func @transform_1(%arg0: i32, %arg1: i32) -> (i32, i32) {
    %c1_i32 = arith.constant 1 : i32
    %0 = arith.muli %arg0, %c1_i32 : i32
    %1 = arith.addi %0, %arg1 : i32
    %c0_i32 = arith.constant 0 : i32
    %2 = arith.minsi %1, %c0_i32 : i32
    %c0_i32_0 = arith.constant 0 : i32
    %c0_i32_1 = arith.constant 0 : i32
    return %2, %c0_i32_0 : i32, i32
  }
  func.func @transform_2(%arg0: i32, %arg1: i32) -> (i32, i32) {
    %c1_i32 = arith.constant 1 : i32
    %0 = arith.muli %arg0, %c1_i32 : i32
    %1 = arith.addi %arg1, %0 : i32
    %c0_i32 = arith.constant 0 : i32
    %2 = arith.minsi %1, %c0_i32 : i32
    %c0_i32_0 = arith.constant 0 : i32
    %c0_i32_1 = arith.constant 0 : i32
    return %2, %c0_i32_0 : i32, i32
  }
  func.func @transform_3(%arg0: i32, %arg1: i32) -> (i32, i32) {
    %c1_i32 = arith.constant 1 : i32
    %0 = arith.muli %arg0, %c1_i32 : i32
    %1 = arith.addi %arg1, %0 : i32
    %c0_i32 = arith.constant 0 : i32
    %2 = arith.minsi %1, %c0_i32 : i32
    %c0_i32_0 = arith.constant 0 : i32
    %c0_i32_1 = arith.constant 0 : i32
    return %c0_i32_0, %2 : i32, i32
  }
  func.func @transform_4(%arg0: i32, %arg1: i32) -> (i32, i32) {
    %c0_i32 = arith.constant 0 : i32
    %c0_i32_0 = arith.constant 0 : i32
    %c0_i32_1 = arith.constant 0 : i32
    return %c0_i32, %c0_i32_0 : i32, i32
  }
  func.func @transform_5(%arg0: i32, %arg1: i32) -> (i32, i32) {
    %c0_i32 = arith.constant 0 : i32
    %c0_i32_0 = arith.constant 0 : i32
    %c0_i32_1 = arith.constant 0 : i32
    return %c0_i32, %c0_i32_0 : i32, i32
  }
  func.func @transform_6(%arg0: i32, %arg1: i32) -> (i32, i32) {
    %c0_i32 = arith.constant 0 : i32
    %c0_i32_0 = arith.constant 0 : i32
    %c0_i32_1 = arith.constant 0 : i32
    return %c0_i32, %c0_i32_0 : i32, i32
  }
  func.func @transform_7(%arg0: i32, %arg1: i32) -> (i32, i32) {
    %c0_i32 = arith.constant 0 : i32
    %c0_i32_0 = arith.constant 0 : i32
    %c0_i32_1 = arith.constant 0 : i32
    return %c0_i32, %c0_i32_0 : i32, i32
  }
  func.func @transform_8(%arg0: i32, %arg1: i32) -> (i32, i32) {
    %c0_i32 = arith.constant 0 : i32
    %c0_i32_0 = arith.constant 0 : i32
    %c0_i32_1 = arith.constant 0 : i32
    return %c0_i32, %c0_i32_0 : i32, i32
  }
  func.func @transform_9(%arg0: i32, %arg1: i32) -> (i32, i32) {
    %c0_i32 = arith.constant 0 : i32
    %c0_i32_0 = arith.constant 0 : i32
    %c0_i32_1 = arith.constant 0 : i32
    return %c0_i32, %c0_i32_0 : i32, i32
  }
  func.func @transform_10(%arg0: i32, %arg1: i32) -> (i32, i32) {
    %c0_i32 = arith.constant 0 : i32
    %c0_i32_0 = arith.constant 0 : i32
    %c0_i32_1 = arith.constant 0 : i32
    return %c0_i32, %c0_i32_0 : i32, i32
  }
  func.func @transform_11(%arg0: i32, %arg1: i32) -> (i32, i32) {
    %c0_i32 = arith.constant 0 : i32
    %c0_i32_0 = arith.constant 0 : i32
    %c0_i32_1 = arith.constant 0 : i32
    return %c0_i32, %c0_i32_0 : i32, i32
  }
  func.func @transform_12(%arg0: i32, %arg1: i32) -> (i32, i32) {
    %c0_i32 = arith.constant 0 : i32
    %c0_i32_0 = arith.constant 0 : i32
    return %arg0, %c0_i32 : i32, i32
  }
}

</mosaic_0001>

<bundles_post_ra>
// kernel: tpu_custom_call.1
= control target key start
LH: loop header
LB: loop body
LE: loop exit
PB: predicated region body
PF: predicated region fallthrough
CT: control target
= control target key end

     0   :  { %s2191_s0 = inlined_call_operand.hbm [shape: bf16[16,32], index: 0, kind: input, shape index: {}]   ;;  %s2192_s1 = inlined_call_operand.vmem [shape: s32[16,1], index: 1, kind: input, shape index: {}]   ;;  %s2193_s2 = inlined_call_operand.hbm [shape: bf16[16,32], index: 2, kind: input, shape index: {}]   ;;  %s2194_s3 = inlined_call_operand.hbm [shape: f32[2,16], index: 3, kind: input, shape index: {}]   ;;  %s2195_s4 = inlined_call_operand.vmem [shape: f32[16,16], index: 4, kind: input, shape index: {}]   ;;  %s2196_s5 = inlined_call_operand.hbm [shape: f32[16,16], index: 5, kind: input, shape index: {}]   ;;  %s2197_s6 = inlined_call_operand.hbm [shape: f32[16,16], index: 6, kind: input, shape index: {}]   ;;  %s2198_s7 = inlined_call_operand.vmem [shape: f32[16,16], index: 7, kind: input, shape index: {}]   ;;  %s2199_s8 = inlined_call_operand.vmem [shape: f32[2,1], index: 8, kind: input, shape index: {}]   ;;  %s2200_s9 = inlined_call_operand.vmem [shape: f32[2,32], index: 9, kind: input, shape index: {}]   ;;  %s2201_s10 = inlined_call_operand.hbm [shape: bf16[32,32], index: 10, kind: input, shape index: {}]   ;;  %s2202_s11 = inlined_call_operand.vmem [shape: f32[1,32], index: 11, kind: input, shape index: {}]   ;;  %s2203_s12 = inlined_call_operand.hbm [shape: f32[16,128], index: 12, kind: output, shape index: {}]  }
   0x1   :  { %2220 = sst [smem:[#allocation24_spill]] %s2193_s2 }
   0x2   :  { %2221 = sst [smem:[#allocation25_spill]] %s2195_s4 }
   0x3   :  { %2222 = sst [smem:[#allocation26_spill]] %s2196_s5 }
   0x4   :  { %2223 = sst [smem:[#allocation27_spill]] %s2197_s6 }
   0x5   :  { %2224 = sst [smem:[#allocation28_spill]] %s2198_s7 }
   0x6   :  { %2225 = sst [smem:[#allocation29_spill]] %s2199_s8 }
   0x7   :  { %2226 = sst [smem:[#allocation30_spill]] %s2200_s9 }
   0x8   :  { %2227 = sst [smem:[#allocation31_spill]] %s2202_s11 }
   0x9   :  { %2228 = sst [smem:[#allocation32_spill]] %s2203_s12 }
   0xa   :  { %17 = vsyncpa [#allocation5], 0 }
   0xb   :  { %19 = vsyncpa [#allocation5 + $0x1], 0 }
   0xc   :  { %20 = vsyncpa [#allocation8], 0 }
   0xd   :  { %22 = vsyncpa [#allocation8 + $0x1], 0 }
   0xe   :  { %23 = vsyncpa [#allocation11], 0 }
   0xf   :  { %24 = vsyncpa [#allocation14], 0 }
  0x10   :  { %25 = vsyncpa [#allocation6], 0 }
  0x11   :  { %27 = vsyncpa [#allocation6 + $0x1], 0  ;;  %s1832_s21 = smov 0   ;;  %s1834_s22 = smov 0  }
  0x12   :  { %s1836_s23 = smov 0   ;;  %s1838_s24 = smov 0  }
  0x13   :  { %s1840_s25 = smov 0   ;;  %s1842_s26 = smov 0  }
  0x14   :  { %s1844_s27 = smov 0   ;;  %s1846_s28 = smov 0  }
  0x15 LB: > { %2229 = sst [smem:[#allocation21_spill]] %s1722_s21  ;;  %s1871_s29 = sadd.s32 4294967295, %s1750_s28   ;;  %s1750_s28 = sphi %s1846_s28, %s33_s28   ;;  %s1746_s27 = sphi %s1844_s27, %s2273_s27   ;;  %s1742_s26 = sphi %s1842_s26, %s2272_s26   ;;  %s1738_s25 = sphi %s1840_s25, %s2181_s25   ;;  %s1734_s24 = sphi %s1838_s24, %s2271_s24   ;;  %s1730_s23 = sphi %s1836_s23, %s2270_s23   ;;  %s1726_s22 = sphi %s1834_s22, %s2269_s22   ;;  %s1722_s21 = sphi %s1832_s21, %s2268_s21  }
  0x16   : > { %s1234_s30 = sadd.s32 4294967294, %s1750_s28   ;;  %p1719_p0 = scmp.ne.s32.totalorder %s1738_s25, 0 }
  0x17   : > { %p66_p1 = scmp.eq.s32.totalorder %s1750_s28, 0  ;;  %p71_p2 = scmp.ne.s32.totalorder %s1738_s25, %s1734_s24 }
  0x18   : > { %p2205_p3 = scmp.eq.s32.totalorder %s1871_s29, 0  ;;  %p358_p5 = scmp.ne.s32.totalorder %s1730_s23, %s1726_s22 }
  0x19   : > { %p1879_p4 = por %p1719_p0, %p66_p1  ;;  %p359_p7 = scmp.eq.s32.totalorder %s1871_s29, 1 }
  0x1a   : > { %p1887_p6 = por %p2205_p3, %p71_p2  ;;  %p364_p8 = scmp.ne.s32.totalorder %s1726_s22, %s1722_s21 }
  0x1b   : > { %p365_p9 = scmp.eq.s32.totalorder %s1234_s30, 1  ;;  %p1894_p10 = por %p359_p7, %p358_p5 }
  0x1c   : > { %s2231_s15 = scalar_select %p1887_p6, 1, 0 }
  0x1d   : > { %s2232_s16 = scalar_select %p1894_p10, 1, 0 }
  0x1e   : > { %p1235_p11 = scmp.ge.s32.totalorder %s1750_s28, 1  ;;  %p1899_p12 = por %p365_p9, %p364_p8 }
  0x1f   : > { %2233 = sst [smem:[#allocation22_spill]] %s2232_s16  ;;  %p372_p13 = scmp.lt.s32.totalorder %s1750_s28, 3 }
  0x20   : > { %s2234_s17 = scalar_select %p1899_p12, 1, 0 }
  0x21   : > { %p1904_p0 = pnand %p1235_p11, %p372_p13  ;;  %s1752_s19 = smov [#allocation10]  }
  0x22   : > { %2235 = sst [smem:[#allocation23_spill]] %s2234_s17  ;;  %s387_s20 = sshll.u32 %s1752_s19, 4  ;;  %s388_s20 = int_to_ptr.vmem [resolvable:$true] %s387_s20 }
  0x23   : > { %s2236_s18 = scalar_select %p1904_p0, 1, 0 }
  0x24   : > { %p1328_p1 = pneg %p1904_p0  ;;  %s45_s30 = sadd.s32 1, %s1746_s27 }
  0x25   : > { %p1918_p7 = scmp.ge.s32.totalorder %s45_s30, 2  ;;  %s1486_s17 = scalar_lea.vmem %s388_s20, 256 }
  0x26   : > { %p1913_p5 = pnand %p1328_p1, %p2205_p3  ;;  %p1487_p9 = scmp.ne.s32.totalorder %s388_s20, %s1486_s17 }
  0x27   : > { %p1494_p2 = scmp.lt.s32.totalorder %s388_s20, %s388_s20  ;;  %p1495_p1 = scmp.lt.s32.totalorder %s1486_s17, %s1486_s17 }
  0x28   : > { %s2237_s24 = scalar_select %p1913_p5, 1, 0 }
  0x29   : > { %p2213_p8 = pneg %p1913_p5  ;;  %p1496_p3 = por %p1495_p1, %p1494_p2 }
  0x2b   : > { %p1489_p11 = pnand %p1487_p9, %p2213_p8 }
  0x2d   : > { %p1490_p13 = pneg %p1489_p11 }
  0x2f   : > { %p1497_p12 = pnand %p1496_p3, %p1490_p13 }
  0x31   : > { %1500 = shalt.err (!%p1497_p12)
}
  0x32   : > { %s2212_s19 = smov 128   ;;  %s2219_s21 = smov 8  }
  0x33   : > { %s2239_s5 = sld [smem:[#allocation26_spill]]  ;;  %s2275_s30 = smov (%p1918_p7, %s45_s30), 0 }
  0x34   : > { %s345_s17 = ssub.s32 %s1746_s27, %s2275_s30  ;;  %s2240_s8 = sadd.s32 1, %s1730_s23 }
  0x35   : > { %p346_p3 = scmp.eq.s32.totalorder %s345_s17, 0  ;;  %p1355_p12 = scmp.lt.s32.totalorder %s1750_s28, 2 }
  0x36   : > { %s478_s11 = sand.u32 1, %s1750_s28   ;;  %s1755_s9 = smov [#allocation7]  }
  0x37   : > { %s1944_s4 = scalar_select %p346_p3, %s1730_s23, %s2240_s8  }
  0x38   : > { %p1949_p2 = pnand %p1355_p12, %p1879_p4  ;;  %s492_s12 = sshll.u32 %s1755_s9, 4  ;;  %s493_s12 = int_to_ptr.vmem [resolvable:$true] %s492_s12 }
  0x39   : > { %1331 = dma.hbm_to_vmem [thread:$0]  (!%p1913_p5), %s2239_s5, 256, %s388_s20, [#allocation11], %s2212_s19, %s2212_s19, %s2219_s21  }
  0x3a   : > { %s1954_s13 = scalar_lea.sflag [#allocation8], %s478_s11  ;;  %s2242_s2 = sld [smem:[#allocation24_spill]] }
  0x3b   : > { %p1964_p4 = pneg %p1949_p2 }
  0x40   : > { %s1501_s17 = scalar_lea.hbm %s2242_s2, 128 }
  0x41   : > { %p1502_p7 = scmp.ne.s32.totalorder %s2242_s2, %s1501_s17  ;;  %p1508_p13 = scmp.lt.s32.totalorder %s1501_s17, %s1501_s17 }
  0x43   : > { %p1504_p9 = pnand %p1964_p4, %p1502_p7 }
  0x45   : > { %p1505_p11 = pneg %p1504_p9 }
  0x47   : > { %p1510_p1 = pnand %p1508_p13, %p1505_p11 }
  0x49   : > { %1513 = shalt.err (!%p1510_p1)
}
  0x4a   : > { %s1514_s9 = scalar_lea.vmem %s493_s12, 128  ;;  %s1521_s11 = scalar_lea.vmem %s493_s12, 256 }
  0x4b   : > { %p1515_p3 = scmp.ne.s32.totalorder %s493_s12, %s1514_s9  ;;  %p1522_p10 = scmp.lt.s32.totalorder %s493_s12, %s493_s12 }
  0x4c   : > { %p1523_p6 = scmp.lt.s32.totalorder %s1521_s11, %s1514_s9 }
  0x4d   : > { %p1517_p12 = pnand %p1515_p3, %p1964_p4 }
  0x4e   : > { %p1524_p0 = por %p1523_p6, %p1522_p10 }
  0x4f   : > { %p1518_p8 = pneg %p1517_p12 }
  0x51   : > { %p1525_p5 = pnand %p1524_p0, %p1518_p8 }
  0x53   : > { %1528 = shalt.err (!%p1525_p5)
}
  0x54   : > { %s1756_s19 = smov 64   ;;  %s1757_s16 = smov 4  }
  0x55   : > { %1344 = dma.hbm_to_vmem [thread:$0]  (!%p1949_p2), %s2242_s2, 128, %s493_s12, %s1954_s13, %s1756_s19, %s1756_s19, %s1757_s16  }
  0x56   : > { %s1758_s8 = smov [#allocation12]   ;;  %s1759_s9 = smov [#allocation13]  }
  0x57   : > { %s400_s21 = sshll.u32 %s1758_s8, 4  ;;  %s422_s11 = sshll.u32 %s1759_s9, 4  ;;  %s401_s21 = int_to_ptr.vmem [resolvable:$true] %s400_s21  ;;  %s423_s11 = int_to_ptr.vmem [resolvable:$true] %s422_s11 }
  0x58   : > { %s1540_s5 = scalar_lea.vmem %s401_s21, 256  ;;  %p2244_p10 = scmp.ne.s32.totalorder %s2237_s24, 0 }
  0x59   : > { %p1541_p6 = scmp.ne.s32.totalorder %s401_s21, %s1540_s5  ;;  %p1548_p7 = scmp.lt.s32.totalorder %s401_s21, %s401_s21 }
  0x5a   : > { %p2245_p0 = pneg %p2244_p10  ;;  %p1549_p9 = scmp.lt.s32.totalorder %s1540_s5, %s1540_s5 }
  0x5c   : > { %p1543_p5 = pnand %p1541_p6, %p2245_p0  ;;  %p1550_p11 = por %p1549_p9, %p1548_p7 }
  0x5e   : > { %p1544_p8 = pneg %p1543_p5 }
  0x60   : > { %p1551_p13 = pnand %p1550_p11, %p1544_p8 }
  0x62   : > { %1554 = shalt.err (!%p1551_p13)
}
  0x63   : > { %s2246_s20 = smov 8   ;;  %s2247_s12 = smov 128  }
  0x64   : > { %s2248_s6 = sld [smem:[#allocation27_spill]]  ;;  %s1566_s9 = scalar_lea.vmem %s423_s11, 256 }
  0x65   : > { %p1567_p1 = scmp.ne.s32.totalorder %s423_s11, %s1566_s9  ;;  %p2249_p3 = pmov %p2245_p0 }
  0x66   : > { %p1574_p0 = scmp.lt.s32.totalorder %s423_s11, %s423_s11  ;;  %p1575_p5 = scmp.lt.s32.totalorder %s1566_s9, %s1566_s9 }
  0x67   : > { %p1569_p12 = pnand %p1567_p1, %p2249_p3 }
  0x68   : > { %p1576_p8 = por %p1575_p5, %p1574_p0 }
  0x69   : > { %p1570_p6 = pneg %p1569_p12 }
  0x6a   : > { %1334 = dma.hbm_to_vmem [thread:$0]  (!%p2244_p10), %s2248_s6, 256, %s401_s21, [#allocation11], %s2247_s12, %s2247_s12, %s2246_s20  }
  0x6b   : > { %p1577_p7 = pnand %p1576_p8, %p1570_p6 }
  0x6d   : > { %1580 = shalt.err (!%p1577_p7)
}
  0x6e   : > { %1337 = dma.hbm_to_vmem [thread:$0]  (!%p2244_p10), %s2201_s10, 256, %s423_s11, [#allocation14], %s1756_s19, %s1756_s19, %s1757_s16  }
  0x6f   : > { %s1760_s21 = smov [#allocation4]   ;;  %s1581_s9 = scalar_lea.hbm %s2191_s0, 128 }
  0x70   : > { %s453_s20 = sshll.u32 %s1760_s21, 4  ;;  %p1582_p9 = scmp.ne.s32.totalorder %s2191_s0, %s1581_s9  ;;  %s454_s20 = int_to_ptr.vmem [resolvable:$true] %s453_s20 }
  0x71   : > { %p1588_p1 = scmp.lt.s32.totalorder %s1581_s9, %s1581_s9 }
  0x72   : > { %p1584_p11 = pnand %p1582_p9, %p1964_p4 }
  0x74   : > { %p1585_p13 = pneg %p1584_p11 }
  0x76   : > { %p1590_p3 = pnand %p1588_p1, %p1585_p13 }
  0x78   : > { %1593 = shalt.err (!%p1590_p3)
}
  0x79   : > { %s1594_s24 = scalar_lea.vmem %s454_s20, 128  ;;  %s1601_s11 = scalar_lea.vmem %s454_s20, 256 }
  0x7a   : > { %p1595_p10 = scmp.ne.s32.totalorder %s454_s20, %s1594_s24  ;;  %p1602_p0 = scmp.lt.s32.totalorder %s454_s20, %s454_s20 }
  0x7b   : > { %p1603_p5 = scmp.lt.s32.totalorder %s1601_s11, %s1594_s24 }
  0x7c   : > { %p1597_p12 = pnand %p1595_p10, %p1964_p4 }
  0x7d   : > { %p1604_p8 = por %p1603_p5, %p1602_p0 }
  0x7e   : > { %p1598_p6 = pneg %p1597_p12 }
  0x80   : > { %p1605_p7 = pnand %p1604_p8, %p1598_p6 }
  0x82   : > { %1608 = shalt.err (!%p1605_p7)
}
  0x83   : > { %1341 = dma.hbm_to_vmem [thread:$0]  (!%p1949_p2), %s2191_s0, 128, %s454_s20, [#allocation5], %s1756_s19, %s1756_s19, %s1757_s16  }
  0x84   : > { %s1761_s5 = smov [#allocation9]   ;;  %s1609_s8 = scalar_lea.hbm %s2194_s3, 32 }
  0x85   : > { %s516_s17 = sshll.u32 %s1761_s5, 4  ;;  %p1610_p9 = scmp.ne.s32.totalorder %s2194_s3, %s1609_s8  ;;  %s517_s17 = int_to_ptr.vmem [resolvable:$true] %s516_s17 }
  0x86   : > { %p1616_p1 = scmp.lt.s32.totalorder %s1609_s8, %s1609_s8 }
  0x87   : > { %p1612_p11 = pnand %p1610_p9, %p1964_p4 }
  0x89   : > { %p1613_p13 = pneg %p1612_p11 }
  0x8b   : > { %p1618_p3 = pnand %p1616_p1, %p1613_p13 }
  0x8d   : > { %1621 = shalt.err (!%p1618_p3)
}
  0x8e   : > { %s1622_s11 = scalar_lea.vmem %s517_s17, 32  ;;  %s1629_s19 = scalar_lea.vmem %s517_s17, 64 }
  0x8f   : > { %p1623_p10 = scmp.ne.s32.totalorder %s517_s17, %s1622_s11  ;;  %p1630_p0 = scmp.lt.s32.totalorder %s517_s17, %s517_s17 }
  0x90   : > { %p1631_p5 = scmp.lt.s32.totalorder %s1629_s19, %s1622_s11 }
  0x91   : > { %p1625_p12 = pnand %p1623_p10, %p1964_p4 }
  0x92   : > { %p1632_p8 = por %p1631_p5, %p1630_p0 }
  0x93   : > { %p1626_p6 = pneg %p1625_p12 }
  0x95   : > { %p1633_p7 = pnand %p1632_p8, %p1626_p6 }
  0x97   : > { %1636 = shalt.err (!%p1633_p7)
}
  0x98   : > { %1347 = dma.hbm_to_vmem [thread:$0]  (!%p1949_p2), %s2194_s3, 32, %s517_s17, %s1954_s13  }
  0x99   : > { %p2250_p9 = scmp.ne.s32.totalorder %s2236_s18, 0 }
  0x9a   : > { %s527_s14 = sand.u32 (!%p2250_p9), 1, %s1738_s25   ;;  %p2251_p4 = scmp.ne.s32.totalorder (!%p2250_p9), %s2231_s15, 0 }
  0x9b   : > { %525 = sbr.rel (%p2250_p9) target bundleno = 1544 (0x608), region = 68  ;;  %s1249_s2 = sshll.u32 (!%p2250_p9), %s527_s14, 3 }
  0x9c   : > { %s528_s6 = scalar_lea.sflag (!%p2250_p9), [#allocation5], %s527_s14  ;;  %s531_s5 = scalar_lea.vmem (!%p2250_p9), [#allocation4], %s1249_s2 }
  0xa0   : > { %1700 = dma.done.wait (%p2251_p4), %s528_s6, 128  }
  0xa1   : > { %1702 = vsyncadd (%p2251_p4), %s528_s6, 4294967168  ;;  %s536_s7 = sand.u32 1, %s1871_s29   ;;  %s2045_s12 = scalar_lea.vmem [#allocation7], %s1249_s2 }
  0xa2   : > { %s537_s21 = scalar_lea.sflag [#allocation8], %s536_s7 }
  0xa3   : > { %1704 = dma.done.wait (%p2251_p4), %s537_s21, 160  }
  0xa4   : > { %1706 = vsyncadd (%p2251_p4), %s537_s21, 4294967136  ;;  %s1251_s18 = sshll.u32 %s527_s14, 1  ;;  %p2252_p2 = scmp.eq.s32.totalorder %s1871_s29, 0 }
  0xa5   : > { %s2051_s13 = scalar_lea.vmem [#allocation9], %s1251_s18 }
  0xa6   : > { %1708 = dma.done.wait (%p2252_p2), [#allocation11], 512   ;;  %p2253_p11 = pmov %p2252_p2 }
  0xa7   : > { %p2254_p13 = pmov %p2252_p2 }
  0xa8   : > { %1710 = vsyncadd (%p2253_p11), [#allocation11], 4294966784 }
  0xa9   : > { %1712 = dma.done.wait (%p2254_p13), [#allocation14], 256   ;;  %p2255_p1 = pmov %p2252_p2 }
  0xaa   : > { %p625_p3 = scmp.lt.s32.totalorder %s1742_s26, 0  ;;  %v1762_v0 = vmov 0   ;;  %v1280_v1 = vld [vmem:[%s531_s5] sm:$0xff]   ;;  %vm656_vm0 = vcmask 261120   ;;  %v681_v14 = vlaneseq  ;;  %s1258_s11 = sshll.u32 %s1742_s26, 4  ;;  %vm648_vm3 = vcmask 0  }
  0xab   : > { %1714 = vsyncadd (%p2255_p1), [#allocation14], 4294967040  ;;  %1443 = vset.pattern.permute.xlu1 %v1762_v0  ;;  %1444 = vset.pattern.permute.xlu0 %v1762_v0  ;;  %v1281_v2 = vunpack.c.l.bf16 %v1280_v1  ;;  %v1282_v3 = vunpack.c.h.bf16 %v1280_v1  ;;  %v706_v27 = vstv %s1258_s11  ;;  %vm650_vm4 = vcmask 254976   ;;  %s617_s19 = sand.u32 1, %s1726_s22   ;;  %p730_p12 = scmp.eq.s32.totalorder %s1742_s26, 0 }
  0xac   : > { %s626_s15 = scalar_select %p625_p3, %s1742_s26, 0  ;;  %v2070_v16 = vand.u32 127, %v681_v14  ;;  %v2078_v26 = vshrl.u32 %v681_v14, 7  ;;  %v1763_v29 = vmov 0.0   ;;  %v1284_v57 = vld [vmem:[%s2045_s12] sm:$0xff] (%p730_p12)   ;;  %vm1765_vm11 = vmmov (%p730_p12), 0  }
  0xad   : > { %v657_v4 = vsel %vm656_vm0, %v1281_v2, -inf  ;;  %v660_v6 = vsel %vm656_vm0, %v1282_v3, -inf  ;;  %649 = vst.msk [vmem:[#allocation2] sm:$0x1] %vm648_vm3, %v1763_v29  ;;  %s2088_s16 = sshll.u32 %s617_s19, 3  ;;  %v1285_v58 = vunpack.c.l.bf16 (%p730_p12), %v1284_v57  ;;  %v1286_v59 = vunpack.c.h.bf16 (%p730_p12), %v1284_v57 }
  0xae   : > { %s1256_s17 = sshll.u32 %s626_s15, 1  ;;  %658 = vmax.xlane.f32.xlu0 %v657_v4  ;;  %v707_v28 = vadd.s32 %v706_v27, %v2078_v26  ;;  %651 = vst.msk [vmem:[#allocation3] sm:$0x3] %vm650_vm4, %v1763_v29  ;;  %v705_v31 = vadd.s32 8, %v2078_v26  ;;  %s619_s20 = scalar_lea.vmem [#allocation15], %s2088_s16  ;;  %vm849_vm14 = vcmask (%p730_p12), 130048  }
  0xaf   : > { %p628_p10 = scmp.lt.s32.totalorder %s1256_s17, 1  ;;  %v740_v60 = vsel (%p730_p12), %vm656_vm0, %v1285_v58, -inf  ;;  %v743_v61 = vsel (%p730_p12), %vm656_vm0, %v1286_v59, -inf }
  0xb0   : > { %vm709_vm5 = vcmp.lt.s32.totalorder %v707_v28, 12  ;;  %v708_v32 = vadd.s32 %v706_v27, %v705_v31 }
  0xb1   : > { %s2277_s17 = smov (!%p628_p10, %s1256_s17), 1  ;;  %v1259_v30 = vsel %vm709_vm5, 1.0, %v1763_v29 }
  0xb2   : > { %s1257_s8 = sshll.u32 %s2277_s17, 3  ;;  %661 = vmax.xlane.f32.xlu0 %v660_v6  ;;  %vm710_vm6 = vcmp.lt.s32.totalorder %v708_v32, 12 }
  0xb3   : > { %s631_s24 = scalar_lea.vmem %s2192_s1, %s1257_s8  ;;  %v1260_v33 = vsel %vm710_vm6, 1.0, %v1763_v29 }
  0xb4   : > { %v683_v5 = vld [vmem:[%s631_s24] sm:$0xff]  ;;  %v684_v7 = vld [vmem:[%s631_s24 + $0x8] sm:$0xff] }
  0xb5   : > { %686 = vperm.xlu1 %1443, %v683_v5   ;;  %v715_v54 = vld [vmem:[#allocation2] sm:$0x1] }
  0xb9   : > { %689 = vperm.xlu1 %1443, %v684_v7  }
 0x130   : > { %v687_v15 = vpop.permute.xlu1 %686 }
 0x131   : > { %vm691_vm1 = vcmp.eq.s32.totalorder %v2070_v16, %v687_v15 }
 0x132   : > { %v693_v19 = vsel %vm691_vm1, %v1281_v2, 0.0 }
 0x133   : > { %v695_v21 = vsel %vm656_vm0, %v693_v19, 0.0  ;;  %v1453_v19 = vld [vmem:[#allocation13 + $0x8] sm:$0xff] (%p730_p12)  }
 0x134   : > { %v690_v17 = vpop.permute.xlu1 %689 }
 0x135   : > { %vm692_vm2 = vcmp.eq.s32.totalorder %v2070_v16, %v690_v17 }
 0x136   : > { %v694_v23 = vsel %vm692_vm2, %v1282_v3, 0.0 }
 0x137   : > { %v659_v8 = vpop.xlane.xlu0 %658  ;;  %v698_v25 = vsel %vm656_vm0, %v694_v23, 0.0 }
 0x138   : > { %v663_v9 = vsub.f32 %v1281_v2, %v659_v8 }
 0x13a   : > { %v665_v10 = vmul.f32 1.442695, %v663_v9  ;;  %v1764_v9 = vmov (%p730_p12), 0.0  }
 0x13b   : > { %v662_v11 = vpop.xlane.xlu0 %661  ;;  %1293 = vmatprep.subr.bf16.mxu0 (%p730_p12), %v1764_v9  ;;  %1301 = vmatprep.subr.mxu1 (%p730_p12), %v1764_v9 }
 0x13c   : > { %1445 = vpow2.f32 %v665_v10  ;;  %v664_v12 = vsub.f32 %v1282_v3, %v662_v11  ;;  %1294 = vmatpush3.bf16.msra.mxu0 (%p730_p12), %v1453_v19  ;;  %1297 = vmatprep.mubr.msk.bf16.mxu0 (%p730_p12), %vm1765_vm11, %v1764_v9 }
 0x13d   : > { %1295 = vmatprep.subr.bf16.mxu0 (%p730_p12), %v1764_v9  ;;  %1305 = vmatprep.mubr.msk.f32.mxu1 (%p730_p12), %vm1765_vm11, %v1764_v9 }
 0x13e   : > { %v667_v13 = vmul.f32 1.442695, %v664_v12 }
 0x140   : > { %1447 = vpow2.f32 %v667_v13 }
 0x149   : > { %v1446_v18 = vpop.eup %1445 }
 0x14a   : > { %v669_v20 = vsel %vm656_vm0, %v1446_v18, 0.0 }
 0x14b   : > { %670 = vadd.xlane.f32.xlu0 %v669_v20  ;;  %v1454_v20 = vld [vmem:[#allocation13] sm:$0xff] (%p730_p12)  }
 0x14c   : > { %1296 = vmatpush3.bf16.msra.mxu0 (%p730_p12), %v1454_v20 }
 0x14d   : > { %v1448_v22 = vpop.eup %1447 }
 0x14e   : > { %v672_v24 = vsel %vm656_vm0, %v1448_v22, 0.0 }
 0x14f   : > { %673 = vadd.xlane.f32.xlu1 %v672_v24  ;;  %696 = vadd.xlane.f32.xlu0 %v695_v21 }
 0x153   : > { %699 = vadd.xlane.f32.xlu0 %v698_v25 }
 0x157   : > { %741 = vmax.xlane.f32.xlu0 (%p730_p12), %v740_v60 }
 0x15b   : > { %744 = vmax.xlane.f32.xlu0 (%p730_p12), %v743_v61 }
 0x1d4   : > { %v671_v34 = vpop.xlane.xlu0 %670 }
 0x1d5   : > { %1449 = vlog2.f32 %v671_v34 }
 0x1d8   : > { %v674_v35 = vpop.xlane.xlu1 %673  ;;  %v697_v38 = vpop.xlane.xlu0 %696 }
 0x1d9   : > { %1451 = vlog2.f32 %v674_v35 }
 0x1dc   : > { %v700_v44 = vpop.xlane.xlu0 %699 }
 0x1e0   : > { %v742_v62 = vpop.xlane.xlu0 (%p730_p12), %741 }
 0x1e1   : > { %vm746_vm7 = vcmp.eq.f32.partialorder (%p730_p12), %v1285_v58, %v742_v62 }
 0x1e2   : > { %v1450_v36 = vpop.eup %1449  ;;  %v748_v63 = vsel (%p730_p12), %vm746_vm7, %v2070_v16, 32 }
 0x1e3   : > { %v676_v37 = vmul.f32 0.6931472, %v1450_v36  ;;  %v750_v1 = vsel (%p730_p12), %vm656_vm0, %v748_v63, 2147483647 }
 0x1e4   : > { %v745_v2 = vpop.xlane.xlu0 (%p730_p12), %744  ;;  %v752_v3 = vshra.s32 (%p730_p12), %v750_v1, 16  ;;  %v751_v10 = vand.u32 (%p730_p12), 65535, %v750_v1 }
 0x1e5   : > { %v679_v39 = vadd.f32 %v676_v37, %v659_v8  ;;  %vm747_vm8 = vcmp.eq.f32.partialorder (%p730_p12), %v1286_v59, %v745_v2 }
 0x1e6   : > { %v1452_v40 = vpop.eup %1451  ;;  %v749_v4 = vsel (%p730_p12), %vm747_vm8, %v2070_v16, 32  ;;  %v754_v5 = vcvt.s32.f32 (%p730_p12), %v752_v3  ;;  %v753_v13 = vcvt.s32.f32 (%p730_p12), %v751_v10 }
 0x1e7   : > { %v678_v41 = vmul.f32 0.6931472, %v1452_v40  ;;  %v716_v42 = vsub.f32 %v679_v39, %v697_v38  ;;  %v765_v6 = vsel (%p730_p12), %vm656_vm0, %v749_v4, 2147483647  ;;  %v848_v38 = vld [vmem:[%s2051_s13] sm:$0x3] (%p730_p12) }
 0x1e8   : > { %755 = vmin.xlane.f32.xlu1 (%p730_p12), %v754_v5  ;;  %v767_v7 = vshra.s32 (%p730_p12), %v765_v6, 16  ;;  %v847_v40 = vld [vmem:[#allocation3] sm:$0x3] (%p730_p12) }
 0x1e9   : > { %v680_v43 = vadd.f32 %v678_v41, %v662_v11  ;;  %v718_v46 = vmul.f32 %v1259_v30, %v716_v42  ;;  %v766_v11 = vand.u32 (%p730_p12), 65535, %v765_v6 }
 0x1ea   : > { %v769_v8 = vcvt.s32.f32 (%p730_p12), %v767_v7 }
 0x1eb   : > { %v717_v45 = vsub.f32 %v680_v43, %v700_v44  ;;  %v768_v17 = vcvt.s32.f32 (%p730_p12), %v766_v11 }
 0x1ec   : > { %770 = vmin.xlane.f32.xlu1 (%p730_p12), %v769_v8 }
 0x1ed   : > { %v719_v47 = vmul.f32 %v1260_v33, %v717_v45 }
 0x1ef   : > { %v720_v48 = vadd.f32 %v719_v47, %v718_v46 }
 0x1f1   : > { %v721_v49 = vrot.slane %v720_v48, 4 }
 0x1f3   : > { %v722_v50 = vadd.f32 %v721_v49, %v720_v48 }
 0x1f5   : > { %v723_v51 = vrot.slane %v722_v50, 2 }
 0x1f7   : > { %v724_v52 = vadd.f32 %v723_v51, %v722_v50 }
 0x1f9   : > { %v725_v53 = vrot.slane %v724_v52, 1 }
 0x1fb   : > { %v726_v55 = vadd.f32 %v725_v53, %v724_v52  ;;  %735 = sbr.rel (!%p730_p12) target bundleno = 1174 (0x496), region = 100 }
 0x1fd   : > { %v727_v56 = vadd.f32 %v726_v55, %v715_v54 }
 0x1ff   : > { %729 = vst.msk [vmem:[#allocation2] sm:$0x1] %vm648_vm3, %v727_v56 }
 0x271   : > { %v756_v12 = vpop.xlane.xlu1 %755 }
 0x272   : > { %vm757_vm9 = vcmp.eq.f32.partialorder %v754_v5, %v756_v12  ;;  %v762_v21 = vcvt.f32.s32 %v756_v12 }
 0x273   : > { %v758_v14 = vsel %vm757_vm9, %v753_v13, inf }
 0x274   : > { %759 = vmin.xlane.f32.xlu0 %v758_v14  ;;  %v763_v23 = vshll.u32 %v762_v21, 16 }
 0x275   : > { %v771_v15 = vpop.xlane.xlu1 %770 }
 0x276   : > { %vm772_vm10 = vcmp.eq.f32.partialorder %v769_v8, %v771_v15  ;;  %v777_v24 = vcvt.f32.s32 %v771_v15 }
 0x277   : > { %v773_v18 = vsel %vm772_vm10, %v768_v17, inf }
 0x278   : > { %774 = vmin.xlane.f32.xlu1 %v773_v18  ;;  %v778_v29 = vshll.u32 %v777_v24, 16 }
 0x2fd   : > { %v760_v22 = vpop.xlane.xlu0 %759 }
 0x2fe   : > { %v761_v25 = vcvt.f32.s32 %v760_v22 }
 0x300   : > { %v764_v27 = vadd.s32 %v763_v23, %v761_v25 }
 0x301   : > { %v775_v28 = vpop.xlane.xlu1 %774 }
 0x302   : > { %v776_v30 = vcvt.f32.s32 %v775_v28  ;;  %vm780_vm12 = vcmp.eq.s32.totalorder %v2070_v16, %v764_v27 }
 0x303   : > { %v1262_v32 = vsel %vm780_vm12, 1.0, %v1764_v9 }
 0x304   : > { %v779_v31 = vadd.s32 %v778_v29, %v776_v30 }
 0x306   : > { %vm781_vm13 = vcmp.eq.s32.totalorder %v2070_v16, %v779_v31 }
 0x307   : > { %v1263_v33 = vsel %vm781_vm13, 1.0, %v1764_v9 }
 0x308   : > { %v786_v34 = vpack.c.bf16 %v1263_v33, %v1262_v32 }
 0x30a   : > { %1298 = vmatmul.mubr.msk.bf16.vlgmr.msra.gmra.mxu0 %vm656_vm0, %v786_v34 }
 0x3ca   : > { %v840_v35 = vpop.f32.mrf.mxu0 }
 0x3cc   : > { %v1299_v36 = vpop.f32.mrf.mxu0 }
 0x3ce   : > { %v843_v37 = vpop.f32.mrf.mxu0 }
 0x3cf   : > { %1302 = vmatpush3.msra.mxu1 %v843_v37 }
 0x3d0   : > { %v1300_v39 = vpop.f32.mrf.mxu0  ;;  %1303 = vmatprep.subr.mxu1 %v1764_v9 }
 0x3d1   : > { %1304 = vmatpush3.msra.mxu1 %v840_v35 }
 0x3d2   : > { %1306 = vmatmul.mubr.msk.f32.vlgmr.msra.gmra.mxu1 %vm849_vm14, %v848_v38 }
 0x492   : > { %v919_v41 = vpop.f32.mrf.mxu1 }
 0x493   : > { %v923_v42 = vadd.f32 %v919_v41, %v847_v40 }
 0x494   : > { %v1307_v43 = vpop.f32.mrf.mxu1 }
 0x495   : > { %925 = vst.msk [vmem:[#allocation3] sm:$0x3] %vm650_vm4, %v923_v42 }
 0x496 PF: > { %s2256_s6 = sld [smem:[#allocation30_spill]]  ;;  %1455 = vset.pattern.permute.xlu1 %v1762_v0  ;;  %1456 = vset.pattern.permute.xlu0 %v1762_v0  ;;  %v932_v56 = vld [vmem:[#allocation10 + $0x8] sm:$0xff]  ;;  %v931_v57 = vld [vmem:[#allocation10] sm:$0xff]  ;;  %v934_v4 = vld [vmem:[#allocation12 + $0x8] sm:$0xff]  ;;  %vm967_vm15 = vcmask 130048   ;;  %vm1022_vm0 = vcmask 1024  }
 0x497   : > { %s2257_s21 = sld [smem:[#allocation31_spill]]  ;;  %v940_v58 = vmul.f32 2.0, %v932_v56  ;;  %v939_v59 = vmul.f32 2.0, %v931_v57  ;;  %v933_v7 = vld [vmem:[#allocation12] sm:$0xff]  ;;  %vm1031_vm1 = vcmp.eq.s32.totalorder %v2078_v26, 0  ;;  %vm1032_vm2 = vcmp.eq.s32.totalorder %v2070_v16, 0 }
 0x498   : > { %s2258_s13 = sld [smem:[#allocation28_spill]]  ;;  %vm1033_vm3 = vmand %vm1031_vm1, %vm1032_vm2  ;;  %vm1048_vm5 = vcmp.eq.s32.totalorder %v2070_v16, 2  ;;  %s1273_s7 = sshll.u32 %s1742_s26, 7 }
 0x499   : > { %v943_v60 = vmul.f32 1.442695, %v940_v58  ;;  %v941_v61 = vmul.f32 1.442695, %v939_v59  ;;  %s2259_s9 = sld [smem:[#allocation25_spill]]  ;;  %vm1049_vm7 = vmand %vm1031_vm1, %vm1048_vm5  ;;  %s1058_s8 = scalar_lea.sflag [#allocation6], %s617_s19 }
 0x49a   : > { %s2261_s5 = sld [smem:[#allocation22_spill]]  ;;  %s1766_s26 = smov [#allocation15]  }
 0x49b   : > { %s2262_s15 = sld [smem:[#allocation32_spill]]  ;;  %s1641_s24 = sshll.u32 %s1766_s26, 4  ;;  %s1642_s24 = int_to_ptr.vmem [resolvable:$false] %s1641_s24 }
 0x49c   : > { %v982_v44 = vld [vmem:[#allocation3] sm:$0x3]  ;;  %v1271_v29 = vld [vmem:[#allocation2] ss:$0 sm:$0xff]  ;;  %s1643_s11 = scalar_lea.vmem %s1642_s24, 256 }
 0x49d   : > { %v983_v45 = vld [vmem:[%s2256_s6] sm:$0x3]  ;;  %s2260_s6 = sld [smem:[#allocation29_spill]] }
 0x49e   : > { %v984_v46 = vadd.f32 %v983_v45, %v982_v44  ;;  %v1270_v47 = vld [vmem:[%s2257_s21] ss:$0 sm:$0xff]  ;;  %v936_v50 = vld [vmem:[%s2258_s13 + $0x8] sm:$0xff]  ;;  %s1071_s21 = sshll.u32 %s619_s20, 4  ;;  %s1072_s21 = int_to_ptr.vmem [resolvable:$true] %s1071_s21 }
 0x49f   : > { %v935_v51 = vld [vmem:[%s2258_s13] sm:$0xff]  ;;  %v952_v53 = vmul.f32 2.0, %v936_v50  ;;  %v930_v3 = vld [vmem:[%s2259_s9 + $0x8] sm:$0xff]  ;;  %v938_v18 = vsub.f32 %v936_v50, %v932_v56  ;;  %s1637_s29 = scalar_lea.vmem %s1072_s21, 128  ;;  %p1644_p7 = scmp.lt.s32.totalorder %s1072_s21, %s1642_s24 }
 0x4a0   : > { %1457 = vtanh.f32 %v984_v46  ;;  %v951_v0 = vmul.f32 2.0, %v935_v51  ;;  %v929_v5 = vld [vmem:[%s2259_s9] sm:$0xff]  ;;  %v946_v6 = vsub.f32 %v930_v3, %v934_v4  ;;  %v937_v20 = vsub.f32 %v935_v51, %v931_v57  ;;  %p1638_p6 = scmp.ne.s32.totalorder %s1072_s21, %s1637_s29  ;;  %p2263_p0 = scmp.ne.s32.totalorder %s2261_s5, 0 }
 0x4a1   : > { %v955_v54 = vmul.f32 1.442695, %v952_v53  ;;  %v945_v8 = vsub.f32 %v929_v5, %v933_v7  ;;  %s2141_s17 = scalar_lea.hbm %s2262_s15, %s1273_s7  ;;  %p1645_p9 = scmp.lt.s32.totalorder %s1643_s11, %s1637_s29 }
 0x4a2   : > { %v953_v55 = vmul.f32 1.442695, %v951_v0  ;;  %v948_v9 = vmul.f32 %v946_v6, %v946_v6  ;;  %p1639_p5 = pnand %p1638_p6, %p2263_p0 }
 0x4a3   : > { %1459 = vpow2.f32 %v955_v54  ;;  %v947_v11 = vmul.f32 %v945_v8, %v945_v8  ;;  %v1016_v43 = vld [vmem:[%s2260_s6] sm:$0x3]  ;;  %p1646_p4 = por %p1645_p9, %p1644_p7 }
 0x4a4   : > { %1461 = vpow2.f32 %v953_v55  ;;  %v1018_v46 = vsub.f32 1.0, %v1016_v43  ;;  %p1640_p8 = pneg %p1639_p5 }
 0x4a5   : > { %1463 = vpow2.f32 %v943_v60 }
 0x4a6   : > { %1465 = vpow2.f32 %v941_v61  ;;  %p1647_p2 = pnand %p1646_p4, %p1640_p8 }
 0x4ad   : > { %v1458_v48 = vpop.eup %1457 }
 0x4ae   : > { %v993_v49 = vmul.f32 %v1458_v48, %v1270_v47 }
 0x4b0   : > { %v995_v52 = vsel %vm650_vm4, %v993_v49, 0.0  ;;  %v1460_v62 = vpop.eup %1459  ;;  %vm1045_vm4 = vcmp.eq.s32.totalorder %v2070_v16, 1 }
 0x4b1   : > { %996 = vadd.xlane.f32.xlu0 %v995_v52  ;;  %v1462_v63 = vpop.eup %1461  ;;  %v958_v1 = vmul.f32 2.0, %v1460_v62  ;;  %vm1046_vm6 = vmand %vm1031_vm1, %vm1045_vm4 }
 0x4b2   : > { %v957_v2 = vmul.f32 2.0, %v1462_v63  ;;  %v1464_v10 = vpop.eup %1463 }
 0x4b3   : > { %1467 = vrcp.f32 %v958_v1  ;;  %v1466_v12 = vpop.eup %1465  ;;  %v950_v13 = vadd.f32 %v1464_v10, %v948_v9 }
 0x4b4   : > { %1469 = vrcp.f32 %v957_v2  ;;  %v949_v15 = vadd.f32 %v1466_v12, %v947_v11 }
 0x4c0   : > { %v1468_v14 = vpop.eup %1467 }
 0x4c1   : > { %v1470_v17 = vpop.eup %1469  ;;  %v962_v19 = vmul.f32 %v1468_v14, %v950_v13 }
 0x4c2   : > { %v960_v21 = vmul.f32 %v1470_v17, %v949_v15 }
 0x4c3   : > { %v964_v22 = vadd.f32 %v962_v19, %v938_v18 }
 0x4c4   : > { %v963_v23 = vadd.f32 %v960_v21, %v937_v20 }
 0x4c5   : > { %v1269_v24 = vadd.f32 -0.5, %v964_v22 }
 0x4c6   : > { %v1268_v25 = vadd.f32 -0.5, %v963_v23 }
 0x4c7   : > { %v971_v27 = vsel %vm967_vm15, %v1269_v24, 0.0 }
 0x4c8   : > { %972 = vadd.xlane.f32.xlu1 %v971_v27  ;;  %v968_v28 = vsel %vm967_vm15, %v1268_v25, 0.0 }
 0x4c9   : > { %969 = vadd.xlane.f32.xlu0 %v968_v28 }
 0x4d9   : > { %1041 = vperm.xlu1 %1455, %v1271_v29  }
 0x53a   : > { %v997_v30 = vpop.xlane.xlu0 %996 }
 0x53b   : > { %v998_v31 = vand.u32 2147483647, %v997_v30  ;;  %v1005_v36 = vsub.f32 0.0, %v997_v30  ;;  %v1011_v40 = vmax.f32 %v997_v30, 0.0 }
 0x53d   : > { %v999_v32 = vsub.f32 0.0, %v998_v31  ;;  %v1006_v39 = vmax.f32 %v1005_v36, 0.0 }
 0x53f   : > { %v1000_v33 = vmul.f32 1.442695, %v999_v32 }
 0x541   : > { %1471 = vpow2.f32 %v1000_v33 }
 0x54e   : > { %v1472_v34 = vpop.eup %1471 }
 0x54f   : > { %v1002_v35 = vadd.f32 1.0, %v1472_v34 }
 0x551   : > { %1473 = vlog2.f32 %v1002_v35  ;;  %v973_v62 = vpop.xlane.xlu1 %972 }
 0x552   : > { %v970_v63 = vpop.xlane.xlu0 %969 }
 0x553   : > { %v974_v1 = vadd.f32 %v973_v62, %v970_v63 }
 0x555   : > { %v975_v2 = vrot.slane %v974_v1, 4  ;;  %v1042_v8 = vpop.permute.xlu1 %1041 }
 0x556   : > { %v1044_v10 = vsel %vm1033_vm3, %v1042_v8, 0.0 }
 0x557   : > { %v976_v3 = vadd.f32 %v975_v2, %v974_v1 }
 0x559   : > { %v977_v4 = vrot.slane %v976_v3, 2 }
 0x55b   : > { %v978_v5 = vadd.f32 %v977_v4, %v976_v3 }
 0x55d   : > { %v979_v6 = vrot.slane %v978_v5, 1 }
 0x55e   : > { %v1474_v37 = vpop.eup %1473 }
 0x55f   : > { %v1004_v38 = vmul.f32 0.6931472, %v1474_v37  ;;  %v980_v7 = vadd.f32 %v979_v6, %v978_v5 }
 0x561   : > { %v1007_v41 = vadd.f32 %v1006_v39, %v1004_v38  ;;  %v1012_v42 = vadd.f32 %v1011_v40, %v1004_v38  ;;  %v981_v9 = vmul.f32 0.00390625, %v980_v7 }
 0x563   : > { %v1008_v44 = vsub.f32 0.0, %v1007_v41  ;;  %v1013_v45 = vsub.f32 0.0, %v1012_v42  ;;  %v1047_v26 = vsel %vm1046_vm6, %v981_v9, %v1044_v10 }
 0x565   : > { %v1009_v47 = vmax.f32 %v1008_v44, -16.118095  ;;  %v1014_v48 = vmax.f32 %v1013_v45, -16.118095 }
 0x567   : > { %v1010_v49 = vmin.f32 %v1009_v47, -1.0000001e-07  ;;  %v1015_v50 = vmin.f32 %v1014_v48, -1.0000001e-07 }
 0x569   : > { %v1017_v51 = vmul.f32 %v1016_v43, %v1010_v49  ;;  %v1019_v52 = vmul.f32 %v1018_v46, %v1015_v50 }
 0x56b   : > { %v1020_v53 = vadd.f32 %v1019_v52, %v1017_v51 }
 0x56d   : > { %v1021_v0 = vsub.f32 0.0, %v1020_v53 }
 0x56f   : > { %v1023_v54 = vsel %vm1022_vm0, %v1021_v0, 0.0 }
 0x570   : > { %v1024_v55 = vrot.slane %v1023_v54, 4 }
 0x572   : > { %v1025_v56 = vadd.f32 %v1024_v55, %v1023_v54 }
 0x574   : > { %v1026_v57 = vrot.slane %v1025_v56, 2 }
 0x576   : > { %v1027_v58 = vadd.f32 %v1026_v57, %v1025_v56 }
 0x578   : > { %v1028_v59 = vrot.slane %v1027_v58, 1 }
 0x57a   : > { %v1029_v60 = vadd.f32 %v1028_v59, %v1027_v58 }
 0x57c   : > { %v1030_v61 = vmul.f32 0.5, %v1029_v60 }
 0x57e   : > { %1052 = vperm.xlu0 %1456, %v1030_v61  }
 0x5f9   : > { %v1053_v11 = vpop.permute.xlu0 %1052 }
 0x5fa   : > { %v1055_v12 = vsel %vm1049_vm7, %v1053_v11, %v1047_v26 }
 0x5fb   : > { %1056 = vst [vmem:[%s619_s20] sm:$0xff] %v1055_v12 }
 0x5fc   : > { %1650 = shalt.err (!%p1647_p2)
}
 0x5fd   : > { %s1651_s16 = scalar_lea.hbm %s2141_s17, 128  ;;  %s1655_s14 = scalar_lea.hbm %s2262_s15, 256 }
 0x5fe   : > { %p1652_p11 = scmp.ne.s32.totalorder %s2141_s17, %s1651_s16  ;;  %p1656_p3 = scmp.lt.s32.totalorder %s2141_s17, %s2262_s15 }
 0x5ff   : > { %p1657_p10 = scmp.lt.s32.totalorder %s1655_s14, %s1651_s16 }
 0x600   : > { %p1653_p13 = pnand %p1652_p11, %p2263_p0 }
 0x601   : > { %p1658_p12 = por %p1657_p10, %p1656_p3 }
 0x602   : > { %p1654_p1 = pneg %p1653_p13 }
 0x604   : > { %p1659_p6 = pnand %p1658_p12, %p1654_p1 }
 0x606   : > { %1662 = shalt.err (!%p1659_p6)
}
 0x607   : > { %1326 = dma.vmem_to_hbm [thread:$0]  (%p2263_p0), %s1072_s21, 128, %s2141_s17, %s1058_s8  }
 0x608 PF: > { %s2264_s7 = sld [smem:[#allocation21_spill]]  ;;  %p2267_p8 = scmp.ge.s32.totalorder %s1750_s28, 2 }
 0x609   : > { %s2265_s12 = sld [smem:[#allocation23_spill]] }
 0x60e   : > { %s1083_s18 = sand.u32 1, %s2264_s7  }
 0x60f   : > { %p2266_p5 = scmp.ne.s32.totalorder %s2265_s12, 0  ;;  %s1084_s29 = scalar_lea.sflag [#allocation6], %s1083_s18 }
 0x611   : > { %p1349_p7 = pnand %p2267_p8, %p2266_p5 }
 0x613   : > { %p1350_p9 = pneg %p1349_p7 }
 0x615   : > { %1716 = dma.done.wait (%p1350_p9), %s1084_s29, 128  }
 0x616   : > { %1718 = vsyncadd (%p1350_p9), %s1084_s29, 4294967168  ;;  %s33_s28 = sadd.s32 1, %s1750_s28   ;;  %s2268_s21 = smov %s1726_s22 }
 0x617   : > { %p30_p4 = scmp.ge.s32.totalorder %s33_s28, 4   ;;  %s2269_s22 = smov %s1730_s23 }
 0x618   : > { %s2270_s23 = smov %s1944_s4  ;;  %s2271_s24 = smov %s1738_s25 }
 0x619   : > { %s2181_s25 = smov 0   ;;  %s2272_s26 = smov %s1746_s27 }
 0x61a   : > { %s2273_s27 = smov %s2275_s30  ;;  %32 = sbr.rel (!%p30_p4) target bundleno = 21 (0x15), region = 164 }
 0x61f   :  { %1089 = vsyncpa [#allocation5], 1 }
 0x620   :  { %1091 = vsyncpa [#allocation5 + $0x1], 1 }
 0x621   :  { %1092 = vsyncpa [#allocation8], 1 }
 0x622   :  { %1094 = vsyncpa [#allocation8 + $0x1], 1 }
 0x623   :  { %1095 = vsyncpa [#allocation11], 1 }
 0x624   :  { %1096 = vsyncpa [#allocation14], 1 }
 0x625   :  { %1097 = vsyncpa [#allocation6], 1 }
 0x626   :  { %1099 = vsyncpa [#allocation6 + $0x1], 1 }

// kernel: tpu_custom_call.1
= control target key start
LH: loop header
LB: loop body
LE: loop exit
PB: predicated region body
PF: predicated region fallthrough
CT: control target
= control target key end

     0   :  { %s2191_s0 = inlined_call_operand.hbm [shape: bf16[16,32], index: 0, kind: input, shape index: {}]   ;;  %s2192_s1 = inlined_call_operand.vmem [shape: s32[16,1], index: 1, kind: input, shape index: {}]   ;;  %s2193_s2 = inlined_call_operand.hbm [shape: bf16[16,32], index: 2, kind: input, shape index: {}]   ;;  %s2194_s3 = inlined_call_operand.hbm [shape: f32[2,16], index: 3, kind: input, shape index: {}]   ;;  %s2195_s4 = inlined_call_operand.vmem [shape: f32[16,16], index: 4, kind: input, shape index: {}]   ;;  %s2196_s5 = inlined_call_operand.hbm [shape: f32[16,16], index: 5, kind: input, shape index: {}]   ;;  %s2197_s6 = inlined_call_operand.hbm [shape: f32[16,16], index: 6, kind: input, shape index: {}]   ;;  %s2198_s7 = inlined_call_operand.vmem [shape: f32[16,16], index: 7, kind: input, shape index: {}]   ;;  %s2199_s8 = inlined_call_operand.vmem [shape: f32[2,1], index: 8, kind: input, shape index: {}]   ;;  %s2200_s9 = inlined_call_operand.vmem [shape: f32[2,32], index: 9, kind: input, shape index: {}]   ;;  %s2201_s10 = inlined_call_operand.hbm [shape: bf16[32,32], index: 10, kind: input, shape index: {}]   ;;  %s2202_s11 = inlined_call_operand.vmem [shape: f32[1,32], index: 11, kind: input, shape index: {}]   ;;  %s2203_s12 = inlined_call_operand.hbm [shape: f32[16,128], index: 12, kind: output, shape index: {}]  }
   0x1   :  { %2220 = sst [smem:[#allocation24_spill]] %s2193_s2 }
   0x2   :  { %2221 = sst [smem:[#allocation25_spill]] %s2195_s4 }
   0x3   :  { %2222 = sst [smem:[#allocation26_spill]] %s2196_s5 }
   0x4   :  { %2223 = sst [smem:[#allocation27_spill]] %s2197_s6 }
   0x5   :  { %2224 = sst [smem:[#allocation28_spill]] %s2198_s7 }
   0x6   :  { %2225 = sst [smem:[#allocation29_spill]] %s2199_s8 }
   0x7   :  { %2226 = sst [smem:[#allocation30_spill]] %s2200_s9 }
   0x8   :  { %2227 = sst [smem:[#allocation31_spill]] %s2202_s11 }
   0x9   :  { %2228 = sst [smem:[#allocation32_spill]] %s2203_s12 }
   0xa   :  { %17 = vsyncpa [#allocation5], 0 }
   0xb   :  { %19 = vsyncpa [#allocation5 + $0x1], 0 }
   0xc   :  { %20 = vsyncpa [#allocation8], 0 }
   0xd   :  { %22 = vsyncpa [#allocation8 + $0x1], 0 }
   0xe   :  { %23 = vsyncpa [#allocation11], 0 }
   0xf   :  { %24 = vsyncpa [#allocation14], 0 }
  0x10   :  { %25 = vsyncpa [#allocation6], 0 }
  0x11   :  { %27 = vsyncpa [#allocation6 + $0x1], 0  ;;  %s1832_s21 = smov 0   ;;  %s1834_s22 = smov 0  }
  0x12   :  { %s1836_s23 = smov 0   ;;  %s1838_s24 = smov 0  }
  0x13   :  { %s1840_s25 = smov 0   ;;  %s1842_s26 = smov 0  }
  0x14   :  { %s1844_s27 = smov 0   ;;  %s1846_s28 = smov 0  }
  0x15 LB: > { %2229 = sst [smem:[#allocation21_spill]] %s1722_s21  ;;  %s1871_s29 = sadd.s32 4294967295, %s1750_s28   ;;  %s1750_s28 = sphi %s1846_s28, %s33_s28   ;;  %s1746_s27 = sphi %s1844_s27, %s2273_s27   ;;  %s1742_s26 = sphi %s1842_s26, %s2272_s26   ;;  %s1738_s25 = sphi %s1840_s25, %s2181_s25   ;;  %s1734_s24 = sphi %s1838_s24, %s2271_s24   ;;  %s1730_s23 = sphi %s1836_s23, %s2270_s23   ;;  %s1726_s22 = sphi %s1834_s22, %s2269_s22   ;;  %s1722_s21 = sphi %s1832_s21, %s2268_s21  }
  0x16   : > { %s1234_s30 = sadd.s32 4294967294, %s1750_s28   ;;  %p1719_p0 = scmp.ne.s32.totalorder %s1738_s25, 0 }
  0x17   : > { %p66_p1 = scmp.eq.s32.totalorder %s1750_s28, 0  ;;  %p71_p2 = scmp.ne.s32.totalorder %s1738_s25, %s1734_s24 }
  0x18   : > { %p2205_p3 = scmp.eq.s32.totalorder %s1871_s29, 0  ;;  %p358_p5 = scmp.ne.s32.totalorder %s1730_s23, %s1726_s22 }
  0x19   : > { %p1879_p4 = por %p1719_p0, %p66_p1  ;;  %p359_p7 = scmp.eq.s32.totalorder %s1871_s29, 1 }
  0x1a   : > { %p1887_p6 = por %p2205_p3, %p71_p2  ;;  %p364_p8 = scmp.ne.s32.totalorder %s1726_s22, %s1722_s21 }
  0x1b   : > { %p365_p9 = scmp.eq.s32.totalorder %s1234_s30, 1  ;;  %p1894_p10 = por %p359_p7, %p358_p5 }
  0x1c   : > { %s2231_s15 = scalar_select %p1887_p6, 1, 0 }
  0x1d   : > { %s2232_s16 = scalar_select %p1894_p10, 1, 0 }
  0x1e   : > { %p1235_p11 = scmp.ge.s32.totalorder %s1750_s28, 1  ;;  %p1899_p12 = por %p365_p9, %p364_p8 }
  0x1f   : > { %2233 = sst [smem:[#allocation22_spill]] %s2232_s16  ;;  %p372_p13 = scmp.lt.s32.totalorder %s1750_s28, 3 }
  0x20   : > { %s2234_s17 = scalar_select %p1899_p12, 1, 0 }
  0x21   : > { %p1904_p0 = pnand %p1235_p11, %p372_p13  ;;  %s1752_s19 = smov [#allocation10]  }
  0x22   : > { %2235 = sst [smem:[#allocation23_spill]] %s2234_s17  ;;  %s387_s20 = sshll.u32 %s1752_s19, 4  ;;  %s388_s20 = int_to_ptr.vmem [resolvable:$true] %s387_s20 }
  0x23   : > { %s2236_s18 = scalar_select %p1904_p0, 1, 0 }
  0x24   : > { %p1328_p1 = pneg %p1904_p0  ;;  %s45_s30 = sadd.s32 1, %s1746_s27 }
  0x25   : > { %p1918_p7 = scmp.ge.s32.totalorder %s45_s30, 2  ;;  %s1486_s17 = scalar_lea.vmem %s388_s20, 256 }
  0x26   : > { %p1913_p5 = pnand %p1328_p1, %p2205_p3  ;;  %p1487_p9 = scmp.ne.s32.totalorder %s388_s20, %s1486_s17 }
  0x27   : > { %p1494_p2 = scmp.lt.s32.totalorder %s388_s20, %s388_s20  ;;  %p1495_p1 = scmp.lt.s32.totalorder %s1486_s17, %s1486_s17 }
  0x28   : > { %s2237_s24 = scalar_select %p1913_p5, 1, 0 }
  0x29   : > { %p2213_p8 = pneg %p1913_p5  ;;  %p1496_p3 = por %p1495_p1, %p1494_p2 }
  0x2b   : > { %p1489_p11 = pnand %p1487_p9, %p2213_p8 }
  0x2d   : > { %p1490_p13 = pneg %p1489_p11 }
  0x2f   : > { %p1497_p12 = pnand %p1496_p3, %p1490_p13 }
  0x31   : > { %1500 = shalt.err (!%p1497_p12)
}
  0x32   : > { %s2212_s19 = smov 128   ;;  %s2219_s21 = smov 8  }
  0x33   : > { %s2239_s5 = sld [smem:[#allocation26_spill]]  ;;  %s2275_s30 = smov (%p1918_p7, %s45_s30), 0 }
  0x34   : > { %s345_s17 = ssub.s32 %s1746_s27, %s2275_s30  ;;  %s2240_s8 = sadd.s32 1, %s1730_s23 }
  0x35   : > { %p346_p3 = scmp.eq.s32.totalorder %s345_s17, 0  ;;  %p1355_p12 = scmp.lt.s32.totalorder %s1750_s28, 2 }
  0x36   : > { %s478_s11 = sand.u32 1, %s1750_s28   ;;  %s1755_s9 = smov [#allocation7]  }
  0x37   : > { %s1944_s4 = scalar_select %p346_p3, %s1730_s23, %s2240_s8  }
  0x38   : > { %p1949_p2 = pnand %p1355_p12, %p1879_p4  ;;  %s492_s12 = sshll.u32 %s1755_s9, 4  ;;  %s493_s12 = int_to_ptr.vmem [resolvable:$true] %s492_s12 }
  0x39   : > { %1331 = dma.hbm_to_vmem [thread:$0]  (!%p1913_p5), %s2239_s5, 256, %s388_s20, [#allocation11], %s2212_s19, %s2212_s19, %s2219_s21  }
  0x3a   : > { %s1954_s13 = scalar_lea.sflag [#allocation8], %s478_s11  ;;  %s2242_s2 = sld [smem:[#allocation24_spill]] }
  0x3b   : > { %p1964_p4 = pneg %p1949_p2 }
  0x40   : > { %s1501_s17 = scalar_lea.hbm %s2242_s2, 128 }
  0x41   : > { %p1502_p7 = scmp.ne.s32.totalorder %s2242_s2, %s1501_s17  ;;  %p1508_p13 = scmp.lt.s32.totalorder %s1501_s17, %s1501_s17 }
  0x43   : > { %p1504_p9 = pnand %p1964_p4, %p1502_p7 }
  0x45   : > { %p1505_p11 = pneg %p1504_p9 }
  0x47   : > { %p1510_p1 = pnand %p1508_p13, %p1505_p11 }
  0x49   : > { %1513 = shalt.err (!%p1510_p1)
}
  0x4a   : > { %s1514_s9 = scalar_lea.vmem %s493_s12, 128  ;;  %s1521_s11 = scalar_lea.vmem %s493_s12, 256 }
  0x4b   : > { %p1515_p3 = scmp.ne.s32.totalorder %s493_s12, %s1514_s9  ;;  %p1522_p10 = scmp.lt.s32.totalorder %s493_s12, %s493_s12 }
  0x4c   : > { %p1523_p6 = scmp.lt.s32.totalorder %s1521_s11, %s1514_s9 }
  0x4d   : > { %p1517_p12 = pnand %p1515_p3, %p1964_p4 }
  0x4e   : > { %p1524_p0 = por %p1523_p6, %p1522_p10 }
  0x4f   : > { %p1518_p8 = pneg %p1517_p12 }
  0x51   : > { %p1525_p5 = pnand %p1524_p0, %p1518_p8 }
  0x53   : > { %1528 = shalt.err (!%p1525_p5)
}
  0x54   : > { %s1756_s19 = smov 64   ;;  %s1757_s16 = smov 4  }
  0x55   : > { %1344 = dma.hbm_to_vmem [thread:$0]  (!%p1949_p2), %s2242_s2, 128, %s493_s12, %s1954_s13, %s1756_s19, %s1756_s19, %s1757_s16  }
  0x56   : > { %s1758_s8 = smov [#allocation12]   ;;  %s1759_s9 = smov [#allocation13]  }
  0x57   : > { %s400_s21 = sshll.u32 %s1758_s8, 4  ;;  %s422_s11 = sshll.u32 %s1759_s9, 4  ;;  %s401_s21 = int_to_ptr.vmem [resolvable:$true] %s400_s21  ;;  %s423_s11 = int_to_ptr.vmem [resolvable:$true] %s422_s11 }
  0x58   : > { %s1540_s5 = scalar_lea.vmem %s401_s21, 256  ;;  %p2244_p10 = scmp.ne.s32.totalorder %s2237_s24, 0 }
  0x59   : > { %p1541_p6 = scmp.ne.s32.totalorder %s401_s21, %s1540_s5  ;;  %p1548_p7 = scmp.lt.s32.totalorder %s401_s21, %s401_s21 }
  0x5a   : > { %p2245_p0 = pneg %p2244_p10  ;;  %p1549_p9 = scmp.lt.s32.totalorder %s1540_s5, %s1540_s5 }
  0x5c   : > { %p1543_p5 = pnand %p1541_p6, %p2245_p0  ;;  %p1550_p11 = por %p1549_p9, %p1548_p7 }
  0x5e   : > { %p1544_p8 = pneg %p1543_p5 }
  0x60   : > { %p1551_p13 = pnand %p1550_p11, %p1544_p8 }
  0x62   : > { %1554 = shalt.err (!%p1551_p13)
}
  0x63   : > { %s2246_s20 = smov 8   ;;  %s2247_s12 = smov 128  }
  0x64   : > { %s2248_s6 = sld [smem:[#allocation27_spill]]  ;;  %s1566_s9 = scalar_lea.vmem %s423_s11, 256 }
  0x65   : > { %p1567_p1 = scmp.ne.s32.totalorder %s423_s11, %s1566_s9  ;;  %p2249_p3 = pmov %p2245_p0 }
  0x66   : > { %p1574_p0 = scmp.lt.s32.totalorder %s423_s11, %s423_s11  ;;  %p1575_p5 = scmp.lt.s32.totalorder %s1566_s9, %s1566_s9 }
  0x67   : > { %p1569_p12 = pnand %p1567_p1, %p2249_p3 }
  0x68   : > { %p1576_p8 = por %p1575_p5, %p1574_p0 }
  0x69   : > { %p1570_p6 = pneg %p1569_p12 }
  0x6a   : > { %1334 = dma.hbm_to_vmem [thread:$0]  (!%p2244_p10), %s2248_s6, 256, %s401_s21, [#allocation11], %s2247_s12, %s2247_s12, %s2246_s20  }
  0x6b   : > { %p1577_p7 = pnand %p1576_p8, %p1570_p6 }
  0x6d   : > { %1580 = shalt.err (!%p1577_p7)
}
  0x6e   : > { %1337 = dma.hbm_to_vmem [thread:$0]  (!%p2244_p10), %s2201_s10, 256, %s423_s11, [#allocation14], %s1756_s19, %s1756_s19, %s1757_s16  }
  0x6f   : > { %s1760_s21 = smov [#allocation4]   ;;  %s1581_s9 = scalar_lea.hbm %s2191_s0, 128 }
  0x70   : > { %s453_s20 = sshll.u32 %s1760_s21, 4  ;;  %p1582_p9 = scmp.ne.s32.totalorder %s2191_s0, %s1581_s9  ;;  %s454_s20 = int_to_ptr.vmem [resolvable:$true] %s453_s20 }
  0x71   : > { %p1588_p1 = scmp.lt.s32.totalorder %s1581_s9, %s1581_s9 }
  0x72   : > { %p1584_p11 = pnand %p1582_p9, %p1964_p4 }
  0x74   : > { %p1585_p13 = pneg %p1584_p11 }
  0x76   : > { %p1590_p3 = pnand %p1588_p1, %p1585_p13 }
  0x78   : > { %1593 = shalt.err (!%p1590_p3)
}
  0x79   : > { %s1594_s24 = scalar_lea.vmem %s454_s20, 128  ;;  %s1601_s11 = scalar_lea.vmem %s454_s20, 256 }
  0x7a   : > { %p1595_p10 = scmp.ne.s32.totalorder %s454_s20, %s1594_s24  ;;  %p1602_p0 = scmp.lt.s32.totalorder %s454_s20, %s454_s20 }
  0x7b   : > { %p1603_p5 = scmp.lt.s32.totalorder %s1601_s11, %s1594_s24 }
  0x7c   : > { %p1597_p12 = pnand %p1595_p10, %p1964_p4 }
  0x7d   : > { %p1604_p8 = por %p1603_p5, %p1602_p0 }
  0x7e   : > { %p1598_p6 = pneg %p1597_p12 }
  0x80   : > { %p1605_p7 = pnand %p1604_p8, %p1598_p6 }
  0x82   : > { %1608 = shalt.err (!%p1605_p7)
}
  0x83   : > { %1341 = dma.hbm_to_vmem [thread:$0]  (!%p1949_p2), %s2191_s0, 128, %s454_s20, [#allocation5], %s1756_s19, %s1756_s19, %s1757_s16  }
  0x84   : > { %s1761_s5 = smov [#allocation9]   ;;  %s1609_s8 = scalar_lea.hbm %s2194_s3, 32 }
  0x85   : > { %s516_s17 = sshll.u32 %s1761_s5, 4  ;;  %p1610_p9 = scmp.ne.s32.totalorder %s2194_s3, %s1609_s8  ;;  %s517_s17 = int_to_ptr.vmem [resolvable:$true] %s516_s17 }
  0x86   : > { %p1616_p1 = scmp.lt.s32.totalorder %s1609_s8, %s1609_s8 }
  0x87   : > { %p1612_p11 = pnand %p1610_p9, %p1964_p4 }
  0x89   : > { %p1613_p13 = pneg %p1612_p11 }
  0x8b   : > { %p1618_p3 = pnand %p1616_p1, %p1613_p13 }
  0x8d   : > { %1621 = shalt.err (!%p1618_p3)
}
  0x8e   : > { %s1622_s11 = scalar_lea.vmem %s517_s17, 32  ;;  %s1629_s19 = scalar_lea.vmem %s517_s17, 64 }
  0x8f   : > { %p1623_p10 = scmp.ne.s32.totalorder %s517_s17, %s1622_s11  ;;  %p1630_p0 = scmp.lt.s32.totalorder %s517_s17, %s517_s17 }
  0x90   : > { %p1631_p5 = scmp.lt.s32.totalorder %s1629_s19, %s1622_s11 }
  0x91   : > { %p1625_p12 = pnand %p1623_p10, %p1964_p4 }
  0x92   : > { %p1632_p8 = por %p1631_p5, %p1630_p0 }
  0x93   : > { %p1626_p6 = pneg %p1625_p12 }
  0x95   : > { %p1633_p7 = pnand %p1632_p8, %p1626_p6 }
  0x97   : > { %1636 = shalt.err (!%p1633_p7)
}
  0x98   : > { %1347 = dma.hbm_to_vmem [thread:$0]  (!%p1949_p2), %s2194_s3, 32, %s517_s17, %s1954_s13  }
  0x99   : > { %p2250_p9 = scmp.ne.s32.totalorder %s2236_s18, 0 }
  0x9a   : > { %s527_s14 = sand.u32 (!%p2250_p9), 1, %s1738_s25   ;;  %p2251_p4 = scmp.ne.s32.totalorder (!%p2250_p9), %s2231_s15, 0 }
  0x9b   : > { %525 = sbr.rel (%p2250_p9) target bundleno = 1544 (0x608), region = 68  ;;  %s1249_s2 = sshll.u32 (!%p2250_p9), %s527_s14, 3 }
  0x9c   : > { %s528_s6 = scalar_lea.sflag (!%p2250_p9), [#allocation5], %s527_s14  ;;  %s531_s5 = scalar_lea.vmem (!%p2250_p9), [#allocation4], %s1249_s2 }
  0xa0   : > { %1700 = dma.done.wait (%p2251_p4), %s528_s6, 128  }
  0xa1   : > { %1702 = vsyncadd (%p2251_p4), %s528_s6, 4294967168  ;;  %s536_s7 = sand.u32 1, %s1871_s29   ;;  %s2045_s12 = scalar_lea.vmem [#allocation7], %s1249_s2 }
  0xa2   : > { %s537_s21 = scalar_lea.sflag [#allocation8], %s536_s7 }
  0xa3   : > { %1704 = dma.done.wait (%p2251_p4), %s537_s21, 160  }
  0xa4   : > { %1706 = vsyncadd (%p2251_p4), %s537_s21, 4294967136  ;;  %s1251_s18 = sshll.u32 %s527_s14, 1  ;;  %p2252_p2 = scmp.eq.s32.totalorder %s1871_s29, 0 }
  0xa5   : > { %s2051_s13 = scalar_lea.vmem [#allocation9], %s1251_s18 }
  0xa6   : > { %1708 = dma.done.wait (%p2252_p2), [#allocation11], 512   ;;  %p2253_p11 = pmov %p2252_p2 }
  0xa7   : > { %p2254_p13 = pmov %p2252_p2 }
  0xa8   : > { %1710 = vsyncadd (%p2253_p11), [#allocation11], 4294966784 }
  0xa9   : > { %1712 = dma.done.wait (%p2254_p13), [#allocation14], 256   ;;  %p2255_p1 = pmov %p2252_p2 }
  0xaa   : > { %p625_p3 = scmp.lt.s32.totalorder %s1742_s26, 0  ;;  %v1762_v0 = vmov 0   ;;  %v1280_v1 = vld [vmem:[%s531_s5] sm:$0xff]   ;;  %vm656_vm0 = vcmask 261120   ;;  %v681_v14 = vlaneseq  ;;  %s1258_s11 = sshll.u32 %s1742_s26, 4  ;;  %vm648_vm3 = vcmask 0  }
  0xab   : > { %1714 = vsyncadd (%p2255_p1), [#allocation14], 4294967040  ;;  %1443 = vset.pattern.permute.xlu1 %v1762_v0  ;;  %1444 = vset.pattern.permute.xlu0 %v1762_v0  ;;  %v1281_v2 = vunpack.c.l.bf16 %v1280_v1  ;;  %v1282_v3 = vunpack.c.h.bf16 %v1280_v1  ;;  %v706_v27 = vstv %s1258_s11  ;;  %vm650_vm4 = vcmask 254976   ;;  %s617_s19 = sand.u32 1, %s1726_s22   ;;  %p730_p12 = scmp.eq.s32.totalorder %s1742_s26, 0 }
  0xac   : > { %s626_s15 = scalar_select %p625_p3, %s1742_s26, 0  ;;  %v2070_v16 = vand.u32 127, %v681_v14  ;;  %v2078_v26 = vshrl.u32 %v681_v14, 7  ;;  %v1763_v29 = vmov 0.0   ;;  %v1284_v57 = vld [vmem:[%s2045_s12] sm:$0xff] (%p730_p12)   ;;  %vm1765_vm11 = vmmov (%p730_p12), 0  }
  0xad   : > { %v657_v4 = vsel %vm656_vm0, %v1281_v2, -inf  ;;  %v660_v6 = vsel %vm656_vm0, %v1282_v3, -inf  ;;  %649 = vst.msk [vmem:[#allocation2] sm:$0x1] %vm648_vm3, %v1763_v29  ;;  %s2088_s16 = sshll.u32 %s617_s19, 3  ;;  %v1285_v58 = vunpack.c.l.bf16 (%p730_p12), %v1284_v57  ;;  %v1286_v59 = vunpack.c.h.bf16 (%p730_p12), %v1284_v57 }
  0xae   : > { %s1256_s17 = sshll.u32 %s626_s15, 1  ;;  %658 = vmax.xlane.f32.xlu0 %v657_v4  ;;  %v707_v28 = vadd.s32 %v706_v27, %v2078_v26  ;;  %651 = vst.msk [vmem:[#allocation3] sm:$0x3] %vm650_vm4, %v1763_v29  ;;  %v705_v31 = vadd.s32 8, %v2078_v26  ;;  %s619_s20 = scalar_lea.vmem [#allocation15], %s2088_s16  ;;  %vm849_vm14 = vcmask (%p730_p12), 130048  }
  0xaf   : > { %p628_p10 = scmp.lt.s32.totalorder %s1256_s17, 1  ;;  %v740_v60 = vsel (%p730_p12), %vm656_vm0, %v1285_v58, -inf  ;;  %v743_v61 = vsel (%p730_p12), %vm656_vm0, %v1286_v59, -inf }
  0xb0   : > { %vm709_vm5 = vcmp.lt.s32.totalorder %v707_v28, 12  ;;  %v708_v32 = vadd.s32 %v706_v27, %v705_v31 }
  0xb1   : > { %s2277_s17 = smov (!%p628_p10, %s1256_s17), 1  ;;  %v1259_v30 = vsel %vm709_vm5, 1.0, %v1763_v29 }
  0xb2   : > { %s1257_s8 = sshll.u32 %s2277_s17, 3  ;;  %661 = vmax.xlane.f32.xlu0 %v660_v6  ;;  %vm710_vm6 = vcmp.lt.s32.totalorder %v708_v32, 12 }
  0xb3   : > { %s631_s24 = scalar_lea.vmem %s2192_s1, %s1257_s8  ;;  %v1260_v33 = vsel %vm710_vm6, 1.0, %v1763_v29 }
  0xb4   : > { %v683_v5 = vld [vmem:[%s631_s24] sm:$0xff]  ;;  %v684_v7 = vld [vmem:[%s631_s24 + $0x8] sm:$0xff] }
  0xb5   : > { %686 = vperm.xlu1 %1443, %v683_v5   ;;  %v715_v54 = vld [vmem:[#allocation2] sm:$0x1] }
  0xb9   : > { %689 = vperm.xlu1 %1443, %v684_v7  }
 0x130   : > { %v687_v15 = vpop.permute.xlu1 %686 }
 0x131   : > { %vm691_vm1 = vcmp.eq.s32.totalorder %v2070_v16, %v687_v15 }
 0x132   : > { %v693_v19 = vsel %vm691_vm1, %v1281_v2, 0.0 }
 0x133   : > { %v695_v21 = vsel %vm656_vm0, %v693_v19, 0.0  ;;  %v1453_v19 = vld [vmem:[#allocation13 + $0x8] sm:$0xff] (%p730_p12)  }
 0x134   : > { %v690_v17 = vpop.permute.xlu1 %689 }
 0x135   : > { %vm692_vm2 = vcmp.eq.s32.totalorder %v2070_v16, %v690_v17 }
 0x136   : > { %v694_v23 = vsel %vm692_vm2, %v1282_v3, 0.0 }
 0x137   : > { %v659_v8 = vpop.xlane.xlu0 %658  ;;  %v698_v25 = vsel %vm656_vm0, %v694_v23, 0.0 }
 0x138   : > { %v663_v9 = vsub.f32 %v1281_v2, %v659_v8 }
 0x13a   : > { %v665_v10 = vmul.f32 1.442695, %v663_v9  ;;  %v1764_v9 = vmov (%p730_p12), 0.0  }
 0x13b   : > { %v662_v11 = vpop.xlane.xlu0 %661  ;;  %1293 = vmatprep.subr.bf16.mxu0 (%p730_p12), %v1764_v9  ;;  %1301 = vmatprep.subr.mxu1 (%p730_p12), %v1764_v9 }
 0x13c   : > { %1445 = vpow2.f32 %v665_v10  ;;  %v664_v12 = vsub.f32 %v1282_v3, %v662_v11  ;;  %1294 = vmatpush3.bf16.msra.mxu0 (%p730_p12), %v1453_v19  ;;  %1297 = vmatprep.mubr.msk.bf16.mxu0 (%p730_p12), %vm1765_vm11, %v1764_v9 }
 0x13d   : > { %1295 = vmatprep.subr.bf16.mxu0 (%p730_p12), %v1764_v9  ;;  %1305 = vmatprep.mubr.msk.f32.mxu1 (%p730_p12), %vm1765_vm11, %v1764_v9 }
 0x13e   : > { %v667_v13 = vmul.f32 1.442695, %v664_v12 }
 0x140   : > { %1447 = vpow2.f32 %v667_v13 }
 0x149   : > { %v1446_v18 = vpop.eup %1445 }
 0x14a   : > { %v669_v20 = vsel %vm656_vm0, %v1446_v18, 0.0 }
 0x14b   : > { %670 = vadd.xlane.f32.xlu0 %v669_v20  ;;  %v1454_v20 = vld [vmem:[#allocation13] sm:$0xff] (%p730_p12)  }
 0x14c   : > { %1296 = vmatpush3.bf16.msra.mxu0 (%p730_p12), %v1454_v20 }
 0x14d   : > { %v1448_v22 = vpop.eup %1447 }
 0x14e   : > { %v672_v24 = vsel %vm656_vm0, %v1448_v22, 0.0 }
 0x14f   : > { %673 = vadd.xlane.f32.xlu1 %v672_v24  ;;  %696 = vadd.xlane.f32.xlu0 %v695_v21 }
 0x153   : > { %699 = vadd.xlane.f32.xlu0 %v698_v25 }
 0x157   : > { %741 = vmax.xlane.f32.xlu0 (%p730_p12), %v740_v60 }
 0x15b   : > { %744 = vmax.xlane.f32.xlu0 (%p730_p12), %v743_v61 }
 0x1d4   : > { %v671_v34 = vpop.xlane.xlu0 %670 }
 0x1d5   : > { %1449 = vlog2.f32 %v671_v34 }
 0x1d8   : > { %v674_v35 = vpop.xlane.xlu1 %673  ;;  %v697_v38 = vpop.xlane.xlu0 %696 }
 0x1d9   : > { %1451 = vlog2.f32 %v674_v35 }
 0x1dc   : > { %v700_v44 = vpop.xlane.xlu0 %699 }
 0x1e0   : > { %v742_v62 = vpop.xlane.xlu0 (%p730_p12), %741 }
 0x1e1   : > { %vm746_vm7 = vcmp.eq.f32.partialorder (%p730_p12), %v1285_v58, %v742_v62 }
 0x1e2   : > { %v1450_v36 = vpop.eup %1449  ;;  %v748_v63 = vsel (%p730_p12), %vm746_vm7, %v2070_v16, 32 }
 0x1e3   : > { %v676_v37 = vmul.f32 0.6931472, %v1450_v36  ;;  %v750_v1 = vsel (%p730_p12), %vm656_vm0, %v748_v63, 2147483647 }
 0x1e4   : > { %v745_v2 = vpop.xlane.xlu0 (%p730_p12), %744  ;;  %v752_v3 = vshra.s32 (%p730_p12), %v750_v1, 16  ;;  %v751_v10 = vand.u32 (%p730_p12), 65535, %v750_v1 }
 0x1e5   : > { %v679_v39 = vadd.f32 %v676_v37, %v659_v8  ;;  %vm747_vm8 = vcmp.eq.f32.partialorder (%p730_p12), %v1286_v59, %v745_v2 }
 0x1e6   : > { %v1452_v40 = vpop.eup %1451  ;;  %v749_v4 = vsel (%p730_p12), %vm747_vm8, %v2070_v16, 32  ;;  %v754_v5 = vcvt.s32.f32 (%p730_p12), %v752_v3  ;;  %v753_v13 = vcvt.s32.f32 (%p730_p12), %v751_v10 }
 0x1e7   : > { %v678_v41 = vmul.f32 0.6931472, %v1452_v40  ;;  %v716_v42 = vsub.f32 %v679_v39, %v697_v38  ;;  %v765_v6 = vsel (%p730_p12), %vm656_vm0, %v749_v4, 2147483647  ;;  %v848_v38 = vld [vmem:[%s2051_s13] sm:$0x3] (%p730_p12) }
 0x1e8   : > { %755 = vmin.xlane.f32.xlu1 (%p730_p12), %v754_v5  ;;  %v767_v7 = vshra.s32 (%p730_p12), %v765_v6, 16  ;;  %v847_v40 = vld [vmem:[#allocation3] sm:$0x3] (%p730_p12) }
 0x1e9   : > { %v680_v43 = vadd.f32 %v678_v41, %v662_v11  ;;  %v718_v46 = vmul.f32 %v1259_v30, %v716_v42  ;;  %v766_v11 = vand.u32 (%p730_p12), 65535, %v765_v6 }
 0x1ea   : > { %v769_v8 = vcvt.s32.f32 (%p730_p12), %v767_v7 }
 0x1eb   : > { %v717_v45 = vsub.f32 %v680_v43, %v700_v44  ;;  %v768_v17 = vcvt.s32.f32 (%p730_p12), %v766_v11 }
 0x1ec   : > { %770 = vmin.xlane.f32.xlu1 (%p730_p12), %v769_v8 }
 0x1ed   : > { %v719_v47 = vmul.f32 %v1260_v33, %v717_v45 }
 0x1ef   : > { %v720_v48 = vadd.f32 %v719_v47, %v718_v46 }
 0x1f1   : > { %v721_v49 = vrot.slane %v720_v48, 4 }
 0x1f3   : > { %v722_v50 = vadd.f32 %v721_v49, %v720_v48 }
 0x1f5   : > { %v723_v51 = vrot.slane %v722_v50, 2 }
 0x1f7   : > { %v724_v52 = vadd.f32 %v723_v51, %v722_v50 }
 0x1f9   : > { %v725_v53 = vrot.slane %v724_v52, 1 }
 0x1fb   : > { %v726_v55 = vadd.f32 %v725_v53, %v724_v52  ;;  %735 = sbr.rel (!%p730_p12) target bundleno = 1174 (0x496), region = 100 }
 0x1fd   : > { %v727_v56 = vadd.f32 %v726_v55, %v715_v54 }
 0x1ff   : > { %729 = vst.msk [vmem:[#allocation2] sm:$0x1] %vm648_vm3, %v727_v56 }
 0x271   : > { %v756_v12 = vpop.xlane.xlu1 %755 }
 0x272   : > { %vm757_vm9 = vcmp.eq.f32.partialorder %v754_v5, %v756_v12  ;;  %v762_v21 = vcvt.f32.s32 %v756_v12 }
 0x273   : > { %v758_v14 = vsel %vm757_vm9, %v753_v13, inf }
 0x274   : > { %759 = vmin.xlane.f32.xlu0 %v758_v14  ;;  %v763_v23 = vshll.u32 %v762_v21, 16 }
 0x275   : > { %v771_v15 = vpop.xlane.xlu1 %770 }
 0x276   : > { %vm772_vm10 = vcmp.eq.f32.partialorder %v769_v8, %v771_v15  ;;  %v777_v24 = vcvt.f32.s32 %v771_v15 }
 0x277   : > { %v773_v18 = vsel %vm772_vm10, %v768_v17, inf }
 0x278   : > { %774 = vmin.xlane.f32.xlu1 %v773_v18  ;;  %v778_v29 = vshll.u32 %v777_v24, 16 }
 0x2fd   : > { %v760_v22 = vpop.xlane.xlu0 %759 }
 0x2fe   : > { %v761_v25 = vcvt.f32.s32 %v760_v22 }
 0x300   : > { %v764_v27 = vadd.s32 %v763_v23, %v761_v25 }
 0x301   : > { %v775_v28 = vpop.xlane.xlu1 %774 }
 0x302   : > { %v776_v30 = vcvt.f32.s32 %v775_v28  ;;  %vm780_vm12 = vcmp.eq.s32.totalorder %v2070_v16, %v764_v27 }
 0x303   : > { %v1262_v32 = vsel %vm780_vm12, 1.0, %v1764_v9 }
 0x304   : > { %v779_v31 = vadd.s32 %v778_v29, %v776_v30 }
 0x306   : > { %vm781_vm13 = vcmp.eq.s32.totalorder %v2070_v16, %v779_v31 }
 0x307   : > { %v1263_v33 = vsel %vm781_vm13, 1.0, %v1764_v9 }
 0x308   : > { %v786_v34 = vpack.c.bf16 %v1263_v33, %v1262_v32 }
 0x30a   : > { %1298 = vmatmul.mubr.msk.bf16.vlgmr.msra.gmra.mxu0 %vm656_vm0, %v786_v34 }
 0x3ca   : > { %v840_v35 = vpop.f32.mrf.mxu0 }
 0x3cc   : > { %v1299_v36 = vpop.f32.mrf.mxu0 }
 0x3ce   : > { %v843_v37 = vpop.f32.mrf.mxu0 }
 0x3cf   : > { %1302 = vmatpush3.msra.mxu1 %v843_v37 }
 0x3d0   : > { %v1300_v39 = vpop.f32.mrf.mxu0  ;;  %1303 = vmatprep.subr.mxu1 %v1764_v9 }
 0x3d1   : > { %1304 = vmatpush3.msra.mxu1 %v840_v35 }
 0x3d2   : > { %1306 = vmatmul.mubr.msk.f32.vlgmr.msra.gmra.mxu1 %vm849_vm14, %v848_v38 }
 0x492   : > { %v919_v41 = vpop.f32.mrf.mxu1 }
 0x493   : > { %v923_v42 = vadd.f32 %v919_v41, %v847_v40 }
 0x494   : > { %v1307_v43 = vpop.f32.mrf.mxu1 }
 0x495   : > { %925 = vst.msk [vmem:[#allocation3] sm:$0x3] %vm650_vm4, %v923_v42 }
 0x496 PF: > { %s2256_s6 = sld [smem:[#allocation30_spill]]  ;;  %1455 = vset.pattern.permute.xlu1 %v1762_v0  ;;  %1456 = vset.pattern.permute.xlu0 %v1762_v0  ;;  %v932_v56 = vld [vmem:[#allocation10 + $0x8] sm:$0xff]  ;;  %v931_v57 = vld [vmem:[#allocation10] sm:$0xff]  ;;  %v934_v4 = vld [vmem:[#allocation12 + $0x8] sm:$0xff]  ;;  %vm967_vm15 = vcmask 130048   ;;  %vm1022_vm0 = vcmask 1024  }
 0x497   : > { %s2257_s21 = sld [smem:[#allocation31_spill]]  ;;  %v940_v58 = vmul.f32 2.0, %v932_v56  ;;  %v939_v59 = vmul.f32 2.0, %v931_v57  ;;  %v933_v7 = vld [vmem:[#allocation12] sm:$0xff]  ;;  %vm1031_vm1 = vcmp.eq.s32.totalorder %v2078_v26, 0  ;;  %vm1032_vm2 = vcmp.eq.s32.totalorder %v2070_v16, 0 }
 0x498   : > { %s2258_s13 = sld [smem:[#allocation28_spill]]  ;;  %vm1033_vm3 = vmand %vm1031_vm1, %vm1032_vm2  ;;  %vm1048_vm5 = vcmp.eq.s32.totalorder %v2070_v16, 2  ;;  %s1273_s7 = sshll.u32 %s1742_s26, 7 }
 0x499   : > { %v943_v60 = vmul.f32 1.442695, %v940_v58  ;;  %v941_v61 = vmul.f32 1.442695, %v939_v59  ;;  %s2259_s9 = sld [smem:[#allocation25_spill]]  ;;  %vm1049_vm7 = vmand %vm1031_vm1, %vm1048_vm5  ;;  %s1058_s8 = scalar_lea.sflag [#allocation6], %s617_s19 }
 0x49a   : > { %s2261_s5 = sld [smem:[#allocation22_spill]]  ;;  %s1766_s26 = smov [#allocation15]  }
 0x49b   : > { %s2262_s15 = sld [smem:[#allocation32_spill]]  ;;  %s1641_s24 = sshll.u32 %s1766_s26, 4  ;;  %s1642_s24 = int_to_ptr.vmem [resolvable:$false] %s1641_s24 }
 0x49c   : > { %v982_v44 = vld [vmem:[#allocation3] sm:$0x3]  ;;  %v1271_v29 = vld [vmem:[#allocation2] ss:$0 sm:$0xff]  ;;  %s1643_s11 = scalar_lea.vmem %s1642_s24, 256 }
 0x49d   : > { %v983_v45 = vld [vmem:[%s2256_s6] sm:$0x3]  ;;  %s2260_s6 = sld [smem:[#allocation29_spill]] }
 0x49e   : > { %v984_v46 = vadd.f32 %v983_v45, %v982_v44  ;;  %v1270_v47 = vld [vmem:[%s2257_s21] ss:$0 sm:$0xff]  ;;  %v936_v50 = vld [vmem:[%s2258_s13 + $0x8] sm:$0xff]  ;;  %s1071_s21 = sshll.u32 %s619_s20, 4  ;;  %s1072_s21 = int_to_ptr.vmem [resolvable:$true] %s1071_s21 }
 0x49f   : > { %v935_v51 = vld [vmem:[%s2258_s13] sm:$0xff]  ;;  %v952_v53 = vmul.f32 2.0, %v936_v50  ;;  %v930_v3 = vld [vmem:[%s2259_s9 + $0x8] sm:$0xff]  ;;  %v938_v18 = vsub.f32 %v936_v50, %v932_v56  ;;  %s1637_s29 = scalar_lea.vmem %s1072_s21, 128  ;;  %p1644_p7 = scmp.lt.s32.totalorder %s1072_s21, %s1642_s24 }
 0x4a0   : > { %1457 = vtanh.f32 %v984_v46  ;;  %v951_v0 = vmul.f32 2.0, %v935_v51  ;;  %v929_v5 = vld [vmem:[%s2259_s9] sm:$0xff]  ;;  %v946_v6 = vsub.f32 %v930_v3, %v934_v4  ;;  %v937_v20 = vsub.f32 %v935_v51, %v931_v57  ;;  %p1638_p6 = scmp.ne.s32.totalorder %s1072_s21, %s1637_s29  ;;  %p2263_p0 = scmp.ne.s32.totalorder %s2261_s5, 0 }
 0x4a1   : > { %v955_v54 = vmul.f32 1.442695, %v952_v53  ;;  %v945_v8 = vsub.f32 %v929_v5, %v933_v7  ;;  %s2141_s17 = scalar_lea.hbm %s2262_s15, %s1273_s7  ;;  %p1645_p9 = scmp.lt.s32.totalorder %s1643_s11, %s1637_s29 }
 0x4a2   : > { %v953_v55 = vmul.f32 1.442695, %v951_v0  ;;  %v948_v9 = vmul.f32 %v946_v6, %v946_v6  ;;  %p1639_p5 = pnand %p1638_p6, %p2263_p0 }
 0x4a3   : > { %1459 = vpow2.f32 %v955_v54  ;;  %v947_v11 = vmul.f32 %v945_v8, %v945_v8  ;;  %v1016_v43 = vld [vmem:[%s2260_s6] sm:$0x3]  ;;  %p1646_p4 = por %p1645_p9, %p1644_p7 }
 0x4a4   : > { %1461 = vpow2.f32 %v953_v55  ;;  %v1018_v46 = vsub.f32 1.0, %v1016_v43  ;;  %p1640_p8 = pneg %p1639_p5 }
 0x4a5   : > { %1463 = vpow2.f32 %v943_v60 }
 0x4a6   : > { %1465 = vpow2.f32 %v941_v61  ;;  %p1647_p2 = pnand %p1646_p4, %p1640_p8 }
 0x4ad   : > { %v1458_v48 = vpop.eup %1457 }
 0x4ae   : > { %v993_v49 = vmul.f32 %v1458_v48, %v1270_v47 }
 0x4b0   : > { %v995_v52 = vsel %vm650_vm4, %v993_v49, 0.0  ;;  %v1460_v62 = vpop.eup %1459  ;;  %vm1045_vm4 = vcmp.eq.s32.totalorder %v2070_v16, 1 }
 0x4b1   : > { %996 = vadd.xlane.f32.xlu0 %v995_v52  ;;  %v1462_v63 = vpop.eup %1461  ;;  %v958_v1 = vmul.f32 2.0, %v1460_v62  ;;  %vm1046_vm6 = vmand %vm1031_vm1, %vm1045_vm4 }
 0x4b2   : > { %v957_v2 = vmul.f32 2.0, %v1462_v63  ;;  %v1464_v10 = vpop.eup %1463 }
 0x4b3   : > { %1467 = vrcp.f32 %v958_v1  ;;  %v1466_v12 = vpop.eup %1465  ;;  %v950_v13 = vadd.f32 %v1464_v10, %v948_v9 }
 0x4b4   : > { %1469 = vrcp.f32 %v957_v2  ;;  %v949_v15 = vadd.f32 %v1466_v12, %v947_v11 }
 0x4c0   : > { %v1468_v14 = vpop.eup %1467 }
 0x4c1   : > { %v1470_v17 = vpop.eup %1469  ;;  %v962_v19 = vmul.f32 %v1468_v14, %v950_v13 }
 0x4c2   : > { %v960_v21 = vmul.f32 %v1470_v17, %v949_v15 }
 0x4c3   : > { %v964_v22 = vadd.f32 %v962_v19, %v938_v18 }
 0x4c4   : > { %v963_v23 = vadd.f32 %v960_v21, %v937_v20 }
 0x4c5   : > { %v1269_v24 = vadd.f32 -0.5, %v964_v22 }
 0x4c6   : > { %v1268_v25 = vadd.f32 -0.5, %v963_v23 }
 0x4c7   : > { %v971_v27 = vsel %vm967_vm15, %v1269_v24, 0.0 }
 0x4c8   : > { %972 = vadd.xlane.f32.xlu1 %v971_v27  ;;  %v968_v28 = vsel %vm967_vm15, %v1268_v25, 0.0 }
 0x4c9   : > { %969 = vadd.xlane.f32.xlu0 %v968_v28 }
 0x4d9   : > { %1041 = vperm.xlu1 %1455, %v1271_v29  }
 0x53a   : > { %v997_v30 = vpop.xlane.xlu0 %996 }
 0x53b   : > { %v998_v31 = vand.u32 2147483647, %v997_v30  ;;  %v1005_v36 = vsub.f32 0.0, %v997_v30  ;;  %v1011_v40 = vmax.f32 %v997_v30, 0.0 }
 0x53d   : > { %v999_v32 = vsub.f32 0.0, %v998_v31  ;;  %v1006_v39 = vmax.f32 %v1005_v36, 0.0 }
 0x53f   : > { %v1000_v33 = vmul.f32 1.442695, %v999_v32 }
 0x541   : > { %1471 = vpow2.f32 %v1000_v33 }
 0x54e   : > { %v1472_v34 = vpop.eup %1471 }
 0x54f   : > { %v1002_v35 = vadd.f32 1.0, %v1472_v34 }
 0x551   : > { %1473 = vlog2.f32 %v1002_v35  ;;  %v973_v62 = vpop.xlane.xlu1 %972 }
 0x552   : > { %v970_v63 = vpop.xlane.xlu0 %969 }
 0x553   : > { %v974_v1 = vadd.f32 %v973_v62, %v970_v63 }
 0x555   : > { %v975_v2 = vrot.slane %v974_v1, 4  ;;  %v1042_v8 = vpop.permute.xlu1 %1041 }
 0x556   : > { %v1044_v10 = vsel %vm1033_vm3, %v1042_v8, 0.0 }
 0x557   : > { %v976_v3 = vadd.f32 %v975_v2, %v974_v1 }
 0x559   : > { %v977_v4 = vrot.slane %v976_v3, 2 }
 0x55b   : > { %v978_v5 = vadd.f32 %v977_v4, %v976_v3 }
 0x55d   : > { %v979_v6 = vrot.slane %v978_v5, 1 }
 0x55e   : > { %v1474_v37 = vpop.eup %1473 }
 0x55f   : > { %v1004_v38 = vmul.f32 0.6931472, %v1474_v37  ;;  %v980_v7 = vadd.f32 %v979_v6, %v978_v5 }
 0x561   : > { %v1007_v41 = vadd.f32 %v1006_v39, %v1004_v38  ;;  %v1012_v42 = vadd.f32 %v1011_v40, %v1004_v38  ;;  %v981_v9 = vmul.f32 0.00390625, %v980_v7 }
 0x563   : > { %v1008_v44 = vsub.f32 0.0, %v1007_v41  ;;  %v1013_v45 = vsub.f32 0.0, %v1012_v42  ;;  %v1047_v26 = vsel %vm1046_vm6, %v981_v9, %v1044_v10 }
 0x565   : > { %v1009_v47 = vmax.f32 %v1008_v44, -16.118095  ;;  %v1014_v48 = vmax.f32 %v1013_v45, -16.118095 }
 0x567   : > { %v1010_v49 = vmin.f32 %v1009_v47, -1.0000001e-07  ;;  %v1015_v50 = vmin.f32 %v1014_v48, -1.0000001e-07 }
 0x569   : > { %v1017_v51 = vmul.f32 %v1016_v43, %v1010_v49  ;;  %v1019_v52 = vmul.f32 %v1018_v46, %v1015_v50 }
 0x56b   : > { %v1020_v53 = vadd.f32 %v1019_v52, %v1017_v51 }
 0x56d   : > { %v1021_v0 = vsub.f32 0.0, %v1020_v53 }
 0x56f   : > { %v1023_v54 = vsel %vm1022_vm0, %v1021_v0, 0.0 }
 0x570   : > { %v1024_v55 = vrot.slane %v1023_v54, 4 }
 0x572   : > { %v1025_v56 = vadd.f32 %v1024_v55, %v1023_v54 }
 0x574   : > { %v1026_v57 = vrot.slane %v1025_v56, 2 }
 0x576   : > { %v1027_v58 = vadd.f32 %v1026_v57, %v1025_v56 }
 0x578   : > { %v1028_v59 = vrot.slane %v1027_v58, 1 }
 0x57a   : > { %v1029_v60 = vadd.f32 %v1028_v59, %v1027_v58 }
 0x57c   : > { %v1030_v61 = vmul.f32 0.5, %v1029_v60 }
 0x57e   : > { %1052 = vperm.xlu0 %1456, %v1030_v61  }
 0x5f9   : > { %v1053_v11 = vpop.permute.xlu0 %1052 }
 0x5fa   : > { %v1055_v12 = vsel %vm1049_vm7, %v1053_v11, %v1047_v26 }
 0x5fb   : > { %1056 = vst [vmem:[%s619_s20] sm:$0xff] %v1055_v12 }
 0x5fc   : > { %1650 = shalt.err (!%p1647_p2)
}
 0x5fd   : > { %s1651_s16 = scalar_lea.hbm %s2141_s17, 128  ;;  %s1655_s14 = scalar_lea.hbm %s2262_s15, 256 }
 0x5fe   : > { %p1652_p11 = scmp.ne.s32.totalorder %s2141_s17, %s1651_s16  ;;  %p1656_p3 = scmp.lt.s32.totalorder %s2141_s17, %s2262_s15 }
 0x5ff   : > { %p1657_p10 = scmp.lt.s32.totalorder %s1655_s14, %s1651_s16 }
 0x600   : > { %p1653_p13 = pnand %p1652_p11, %p2263_p0 }
 0x601   : > { %p1658_p12 = por %p1657_p10, %p1656_p3 }
 0x602   : > { %p1654_p1 = pneg %p1653_p13 }
 0x604   : > { %p1659_p6 = pnand %p1658_p12, %p1654_p1 }
 0x606   : > { %1662 = shalt.err (!%p1659_p6)
}
 0x607   : > { %1326 = dma.vmem_to_hbm [thread:$0]  (%p2263_p0), %s1072_s21, 128, %s2141_s17, %s1058_s8  }
 0x608 PF: > { %s2264_s7 = sld [smem:[#allocation21_spill]]  ;;  %p2267_p8 = scmp.ge.s32.totalorder %s1750_s28, 2 }
 0x609   : > { %s2265_s12 = sld [smem:[#allocation23_spill]] }
 0x60e   : > { %s1083_s18 = sand.u32 1, %s2264_s7  }
 0x60f   : > { %p2266_p5 = scmp.ne.s32.totalorder %s2265_s12, 0  ;;  %s1084_s29 = scalar_lea.sflag [#allocation6], %s1083_s18 }
 0x611   : > { %p1349_p7 = pnand %p2267_p8, %p2266_p5 }
 0x613   : > { %p1350_p9 = pneg %p1349_p7 }
 0x615   : > { %1716 = dma.done.wait (%p1350_p9), %s1084_s29, 128  }
 0x616   : > { %1718 = vsyncadd (%p1350_p9), %s1084_s29, 4294967168  ;;  %s33_s28 = sadd.s32 1, %s1750_s28   ;;  %s2268_s21 = smov %s1726_s22 }
 0x617   : > { %p30_p4 = scmp.ge.s32.totalorder %s33_s28, 4   ;;  %s2269_s22 = smov %s1730_s23 }
 0x618   : > { %s2270_s23 = smov %s1944_s4  ;;  %s2271_s24 = smov %s1738_s25 }
 0x619   : > { %s2181_s25 = smov 0   ;;  %s2272_s26 = smov %s1746_s27 }
 0x61a   : > { %s2273_s27 = smov %s2275_s30  ;;  %32 = sbr.rel (!%p30_p4) target bundleno = 21 (0x15), region = 164 }
 0x61f   :  { %1089 = vsyncpa [#allocation5], 1 }
 0x620   :  { %1091 = vsyncpa [#allocation5 + $0x1], 1 }
 0x621   :  { %1092 = vsyncpa [#allocation8], 1 }
 0x622   :  { %1094 = vsyncpa [#allocation8 + $0x1], 1 }
 0x623   :  { %1095 = vsyncpa [#allocation11], 1 }
 0x624   :  { %1096 = vsyncpa [#allocation14], 1 }
 0x625   :  { %1097 = vsyncpa [#allocation6], 1 }
 0x626   :  { %1099 = vsyncpa [#allocation6 + $0x1], 1 }

</bundles_post_ra>
